<compile_context>
chip_gen: v6e
topology: v6e:2x2x1
jax: 0.10.0
libtpu: 0.0.40
codegen_flags: <defaults>
</compile_context>

<pallas_src>
import jax
import jax.numpy as jnp
from jax import lax
from jax.experimental import pallas as pl
from jax.experimental.pallas import tpu as pltpu

# Module constants (synthetic, small but consistent with the forward pass).
OBS_SHAPE = 8          # GRU input feature size D
PPO_RNN_HIDDENS = 32   # GRU hidden size H


def gru_value_kernel(x_ref, lens_ref,
                     wih_r_ref, wih_z_ref, wih_n_ref,
                     whh_r_ref, whh_z_ref, whh_n_ref,
                     bih_r_ref, bih_z_ref, bih_n_ref,
                     bhh_r_ref, bhh_z_ref, bhh_n_ref,
                     wv_ref, bv_ref, out_ref):
    """Single-invocation kernel: full GRU recurrence + value head.

    x_ref      : [T*B, D] f32   (time-major, rows t*B .. t*B+B-1 are timestep t)
    lens_ref   : [B, 1]   i32   (per-sequence valid lengths)
    wih_*_ref  : [D, H]   f32   per-gate input weights (gate order r, z, n)
    whh_*_ref  : [H, H]   f32   per-gate recurrent weights
    bih_*_ref  : [1, H]   f32   per-gate input biases
    bhh_*_ref  : [1, H]   f32   per-gate recurrent biases
    wv_ref     : [1, H]   f32   value-head weight (torch Linear(H,1).weight layout)
    bv_ref     : [1, 1]   f32   value-head bias
    out_ref    : [B, 1]   f32
    """
    TB, _ = x_ref.shape
    B = lens_ref.shape[0]
    T = TB // B
    H = whh_r_ref.shape[0]

    lens = lens_ref[...]                              # [B, 1] i32

    # Load recurrent weights/biases once.
    whh_r = whh_r_ref[...]
    whh_z = whh_z_ref[...]
    whh_n = whh_n_ref[...]
    bhh_r = bhh_r_ref[...]
    bhh_z = bhh_z_ref[...]
    bhh_n = bhh_n_ref[...]

    # ---- Hoisted, time-parallel input projection: one matmul per gate over all
    # T*B rows, done once before the serial recurrence. ----
    x_all = x_ref[...]                                # [T*B, D]
    gi_r = jnp.dot(x_all, wih_r_ref[...],
                   preferred_element_type=jnp.float32) + bih_r_ref[...]   # [T*B, H]
    gi_z = jnp.dot(x_all, wih_z_ref[...],
                   preferred_element_type=jnp.float32) + bih_z_ref[...]
    gi_n = jnp.dot(x_all, wih_n_ref[...],
                   preferred_element_type=jnp.float32) + bih_n_ref[...]

    # ---- Serial recurrence, h carried in registers, fully unrolled (T static). ----
    h = jnp.zeros((B, H), jnp.float32)
    for t in range(T):
        lo = t * B
        gir_t = gi_r[lo:lo + B, :]                    # [B, H] static row slices
        giz_t = gi_z[lo:lo + B, :]
        gin_t = gi_n[lo:lo + B, :]

        gh_r = jnp.dot(h, whh_r, preferred_element_type=jnp.float32) + bhh_r
        gh_z = jnp.dot(h, whh_z, preferred_element_type=jnp.float32) + bhh_z
        gh_n = jnp.dot(h, whh_n, preferred_element_type=jnp.float32) + bhh_n

        # PyTorch GRU gate equations (gate order r, z, n; b_hn inside r*(...)).
        r = jax.nn.sigmoid(gir_t + gh_r)
        z = jax.nn.sigmoid(giz_t + gh_z)
        n = jnp.tanh(gin_t + r * gh_n)
        h_new = (1.0 - z) * n + z * h

        # pack_padded_sequence semantics: only update h while t < length.
        mask = lens > t                               # [B, 1] bool, broadcasts over H
        h = jnp.where(mask, h_new, h)

    # ---- Value head as a VPU/XLU reduction (no N=1 MXU matmul), stored once. ----
    wv_row = wv_ref[...]                              # [1, H]
    out_ref[...] = jnp.sum(h * wv_row, axis=-1, keepdims=True) + bv_ref[...]


def value_network_forward(x, starts, params):
    """x: [B, T, D] f32 (batch_first), starts: [B] lengths -> [B, 1] f32."""
    B, T, D = x.shape

    # Time-major, flattened to [T*B, D] wrapper-side so the kernel's input
    # projection is one dense matmul and per-step slices are static row windows.
    x_flat = jnp.transpose(x, (1, 0, 2)).astype(jnp.float32).reshape(T * B, D)
    lens = starts.astype(jnp.int32).reshape(B, 1)

    vspec = pl.BlockSpec(memory_space=pltpu.MemorySpace.VMEM)

    return pl.pallas_call(
        gru_value_kernel,
        out_shape=jax.ShapeDtypeStruct((B, 1), jnp.float32),
        in_specs=[vspec] * 16,
        out_specs=vspec,
    )(x_flat, lens,
      params["wih_r"], params["wih_z"], params["wih_n"],
      params["whh_r"], params["whh_z"], params["whh_n"],
      params["bih_r"], params["bih_z"], params["bih_n"],
      params["bhh_r"], params["bhh_z"], params["bhh_n"],
      params["wv"], params["bv"])


def init_params(key, d=OBS_SHAPE, h=PPO_RNN_HIDDENS):
    """Deterministic synthetic parameters, pre-split per gate (r, z, n).

    Equivalent to torch GRU weight_ih_l0 [3H,D] / weight_hh_l0 [3H,H] split along
    the gate axis and transposed for `x @ W`; value head uses torch Linear(H,1)
    weight layout [1, H]."""
    k = jax.random.split(key, 14)
    scale = 1.0 / jnp.sqrt(jnp.float32(h))

    def mk(kk, shape):
        return jax.random.normal(kk, shape, jnp.float32) * scale

    return {
        "wih_r": mk(k[0], (d, h)), "wih_z": mk(k[1], (d, h)), "wih_n": mk(k[2], (d, h)),
        "whh_r": mk(k[3], (h, h)), "whh_z": mk(k[4], (h, h)), "whh_n": mk(k[5], (h, h)),
        "bih_r": mk(k[6], (1, h)), "bih_z": mk(k[7], (1, h)), "bih_n": mk(k[8], (1, h)),
        "bhh_r": mk(k[9], (1, h)), "bhh_z": mk(k[10], (1, h)), "bhh_n": mk(k[11], (1, h)),
        "wv": mk(k[12], (1, h)),   # Linear(H, 1).weight shape [1, H]
        "bv": mk(k[13], (1, 1)),
    }


def reference_forward(x, starts, params):
    """Pure-JAX reference of the same semantics (for correctness check)."""
    B, T, D = x.shape
    H = params["whh_r"].shape[0]

    def cell(h, inp):
        x_t, t = inp
        r = jax.nn.sigmoid(x_t @ params["wih_r"] + params["bih_r"]
                           + h @ params["whh_r"] + params["bhh_r"])
        z = jax.nn.sigmoid(x_t @ params["wih_z"] + params["bih_z"]
                           + h @ params["whh_z"] + params["bhh_z"])
        n = jnp.tanh(x_t @ params["wih_n"] + params["bih_n"]
                     + r * (h @ params["whh_n"] + params["bhh_n"]))
        h_new = (1.0 - z) * n + z * h
        mask = (t < starts.astype(jnp.int32))[:, None]
        return jnp.where(mask, h_new, h), None

    h0 = jnp.zeros((B, H), jnp.float32)
    xs = (jnp.transpose(x, (1, 0, 2)), jnp.arange(T, dtype=jnp.int32))
    hT, _ = lax.scan(cell, h0, xs)
    return hT @ params["wv"].T + params["bv"][0]


if __name__ == "__main__":
    B, T, D, H = 2, 8, OBS_SHAPE, PPO_RNN_HIDDENS

    key = jax.random.PRNGKey(0)
    kx, kp = jax.random.split(key)
    x = jax.random.normal(kx, (B, T, D), jnp.float32)
    starts = jnp.array([5, 8], dtype=jnp.int32)   # per-sequence valid lengths
    params = init_params(kp, D, H)

    out = jax.block_until_ready(value_network_forward(x, starts, params))
    assert out.shape == (B, 1)

    ref = jax.block_until_ready(reference_forward(x, starts, params))
    assert jnp.allclose(out, ref, rtol=1e-5, atol=1e-5), (out, ref)

    print("KERNEL_OK")
</pallas_src>

<mosaic_0001>
module attributes {stable_mosaic.version = 11 : i64} {
  func.func @gru_value_kernel(%arg0: memref<16x8xf32, #tpu.memory_space<vmem>>, %arg1: memref<2x1xi32, #tpu.memory_space<vmem>>, %arg2: memref<8x32xf32, #tpu.memory_space<vmem>>, %arg3: memref<8x32xf32, #tpu.memory_space<vmem>>, %arg4: memref<8x32xf32, #tpu.memory_space<vmem>>, %arg5: memref<32x32xf32, #tpu.memory_space<vmem>>, %arg6: memref<32x32xf32, #tpu.memory_space<vmem>>, %arg7: memref<32x32xf32, #tpu.memory_space<vmem>>, %arg8: memref<1x32xf32, #tpu.memory_space<vmem>>, %arg9: memref<1x32xf32, #tpu.memory_space<vmem>>, %arg10: memref<1x32xf32, #tpu.memory_space<vmem>>, %arg11: memref<1x32xf32, #tpu.memory_space<vmem>>, %arg12: memref<1x32xf32, #tpu.memory_space<vmem>>, %arg13: memref<1x32xf32, #tpu.memory_space<vmem>>, %arg14: memref<1x32xf32, #tpu.memory_space<vmem>>, %arg15: memref<1x1xf32, #tpu.memory_space<vmem>>, %arg16: memref<2x1xf32, #tpu.memory_space<vmem>>) attributes {dimension_semantics = [], scalar_prefetch = 0 : i64, scratch_operands = 0 : i64, tpu.core_type = #tpu.core_type<tc>} {
    %c0 = arith.constant 0 : index
    %c0_0 = arith.constant 0 : index
    %0 = vector.load %arg1[%c0, %c0_0] : memref<2x1xi32, #tpu.memory_space<vmem>>, vector<2x1xi32>
    %c0_1 = arith.constant 0 : index
    %c0_2 = arith.constant 0 : index
    %1 = vector.load %arg5[%c0_1, %c0_2] : memref<32x32xf32, #tpu.memory_space<vmem>>, vector<32x32xf32>
    %c0_3 = arith.constant 0 : index
    %c0_4 = arith.constant 0 : index
    %2 = vector.load %arg6[%c0_3, %c0_4] : memref<32x32xf32, #tpu.memory_space<vmem>>, vector<32x32xf32>
    %c0_5 = arith.constant 0 : index
    %c0_6 = arith.constant 0 : index
    %3 = vector.load %arg7[%c0_5, %c0_6] : memref<32x32xf32, #tpu.memory_space<vmem>>, vector<32x32xf32>
    %c0_7 = arith.constant 0 : index
    %c0_8 = arith.constant 0 : index
    %4 = vector.load %arg11[%c0_7, %c0_8] : memref<1x32xf32, #tpu.memory_space<vmem>>, vector<1x32xf32>
    %c0_9 = arith.constant 0 : index
    %c0_10 = arith.constant 0 : index
    %5 = vector.load %arg12[%c0_9, %c0_10] : memref<1x32xf32, #tpu.memory_space<vmem>>, vector<1x32xf32>
    %c0_11 = arith.constant 0 : index
    %c0_12 = arith.constant 0 : index
    %6 = vector.load %arg13[%c0_11, %c0_12] : memref<1x32xf32, #tpu.memory_space<vmem>>, vector<1x32xf32>
    %c0_13 = arith.constant 0 : index
    %c0_14 = arith.constant 0 : index
    %7 = vector.load %arg0[%c0_13, %c0_14] : memref<16x8xf32, #tpu.memory_space<vmem>>, vector<16x8xf32>
    %c0_15 = arith.constant 0 : index
    %c0_16 = arith.constant 0 : index
    %8 = vector.load %arg2[%c0_15, %c0_16] : memref<8x32xf32, #tpu.memory_space<vmem>>, vector<8x32xf32>
    %cst = arith.constant dense<0.000000e+00> : vector<16x32xf32>
    %9 = tpu.matmul %7, %8, %cst {dimension_numbers = #tpu.dot_dimension_numbers<[1], [0], [0], [1], [0, 0, 1, 1], [], []>} : vector<16x8xf32>, vector<8x32xf32>, vector<16x32xf32> -> vector<16x32xf32>
    %c0_17 = arith.constant 0 : index
    %c0_18 = arith.constant 0 : index
    %10 = vector.load %arg8[%c0_17, %c0_18] : memref<1x32xf32, #tpu.memory_space<vmem>>, vector<1x32xf32>
    %11 = vector.broadcast %10 : vector<1x32xf32> to vector<16x32xf32>
    %12 = arith.addf %9, %11 : vector<16x32xf32>
    %c0_19 = arith.constant 0 : index
    %c0_20 = arith.constant 0 : index
    %13 = vector.load %arg3[%c0_19, %c0_20] : memref<8x32xf32, #tpu.memory_space<vmem>>, vector<8x32xf32>
    %cst_21 = arith.constant dense<0.000000e+00> : vector<16x32xf32>
    %14 = tpu.matmul %7, %13, %cst_21 {dimension_numbers = #tpu.dot_dimension_numbers<[1], [0], [0], [1], [0, 0, 1, 1], [], []>} : vector<16x8xf32>, vector<8x32xf32>, vector<16x32xf32> -> vector<16x32xf32>
    %c0_22 = arith.constant 0 : index
    %c0_23 = arith.constant 0 : index
    %15 = vector.load %arg9[%c0_22, %c0_23] : memref<1x32xf32, #tpu.memory_space<vmem>>, vector<1x32xf32>
    %16 = vector.broadcast %15 : vector<1x32xf32> to vector<16x32xf32>
    %17 = arith.addf %14, %16 : vector<16x32xf32>
    %c0_24 = arith.constant 0 : index
    %c0_25 = arith.constant 0 : index
    %18 = vector.load %arg4[%c0_24, %c0_25] : memref<8x32xf32, #tpu.memory_space<vmem>>, vector<8x32xf32>
    %cst_26 = arith.constant dense<0.000000e+00> : vector<16x32xf32>
    %19 = tpu.matmul %7, %18, %cst_26 {dimension_numbers = #tpu.dot_dimension_numbers<[1], [0], [0], [1], [0, 0, 1, 1], [], []>} : vector<16x8xf32>, vector<8x32xf32>, vector<16x32xf32> -> vector<16x32xf32>
    %c0_27 = arith.constant 0 : index
    %c0_28 = arith.constant 0 : index
    %20 = vector.load %arg10[%c0_27, %c0_28] : memref<1x32xf32, #tpu.memory_space<vmem>>, vector<1x32xf32>
    %21 = vector.broadcast %20 : vector<1x32xf32> to vector<16x32xf32>
    %22 = arith.addf %19, %21 : vector<16x32xf32>
    %cst_29 = arith.constant 0.000000e+00 : f32
    %23 = vector.broadcast %cst_29 : f32 to vector<2x32xf32>
    %24 = vector.extract_strided_slice %12 {offsets = [0, 0], sizes = [2, 32], strides = [1, 1]} : vector<16x32xf32> to vector<2x32xf32>
    %25 = vector.extract_strided_slice %17 {offsets = [0, 0], sizes = [2, 32], strides = [1, 1]} : vector<16x32xf32> to vector<2x32xf32>
    %26 = vector.extract_strided_slice %22 {offsets = [0, 0], sizes = [2, 32], strides = [1, 1]} : vector<16x32xf32> to vector<2x32xf32>
    %cst_30 = arith.constant dense<0.000000e+00> : vector<2x32xf32>
    %27 = tpu.matmul %23, %1, %cst_30 {dimension_numbers = #tpu.dot_dimension_numbers<[1], [0], [0], [1], [0, 0, 1, 1], [], []>} : vector<2x32xf32>, vector<32x32xf32>, vector<2x32xf32> -> vector<2x32xf32>
    %28 = vector.broadcast %4 : vector<1x32xf32> to vector<2x32xf32>
    %29 = arith.addf %27, %28 : vector<2x32xf32>
    %cst_31 = arith.constant dense<0.000000e+00> : vector<2x32xf32>
    %30 = tpu.matmul %23, %2, %cst_31 {dimension_numbers = #tpu.dot_dimension_numbers<[1], [0], [0], [1], [0, 0, 1, 1], [], []>} : vector<2x32xf32>, vector<32x32xf32>, vector<2x32xf32> -> vector<2x32xf32>
    %31 = vector.broadcast %5 : vector<1x32xf32> to vector<2x32xf32>
    %32 = arith.addf %30, %31 : vector<2x32xf32>
    %cst_32 = arith.constant dense<0.000000e+00> : vector<2x32xf32>
    %33 = tpu.matmul %23, %3, %cst_32 {dimension_numbers = #tpu.dot_dimension_numbers<[1], [0], [0], [1], [0, 0, 1, 1], [], []>} : vector<2x32xf32>, vector<32x32xf32>, vector<2x32xf32> -> vector<2x32xf32>
    %34 = vector.broadcast %6 : vector<1x32xf32> to vector<2x32xf32>
    %35 = arith.addf %33, %34 : vector<2x32xf32>
    %36 = arith.addf %24, %29 : vector<2x32xf32>
    %37 = arith.negf %36 : vector<2x32xf32>
    %38 = math.exp %37 : vector<2x32xf32>
    %cst_33 = arith.constant 1.000000e+00 : f32
    %39 = vector.broadcast %cst_33 : f32 to vector<2x32xf32>
    %40 = arith.addf %39, %38 : vector<2x32xf32>
    %41 = arith.divf %39, %40 : vector<2x32xf32>
    %42 = arith.addf %25, %32 : vector<2x32xf32>
    %43 = arith.negf %42 : vector<2x32xf32>
    %44 = math.exp %43 : vector<2x32xf32>
    %cst_34 = arith.constant 1.000000e+00 : f32
    %45 = vector.broadcast %cst_34 : f32 to vector<2x32xf32>
    %46 = arith.addf %45, %44 : vector<2x32xf32>
    %47 = arith.divf %45, %46 : vector<2x32xf32>
    %48 = arith.mulf %41, %35 : vector<2x32xf32>
    %49 = arith.addf %26, %48 : vector<2x32xf32>
    %50 = math.tanh %49 : vector<2x32xf32>
    %cst_35 = arith.constant 1.000000e+00 : f32
    %51 = vector.broadcast %cst_35 : f32 to vector<2x32xf32>
    %52 = arith.subf %51, %47 : vector<2x32xf32>
    %53 = arith.mulf %52, %50 : vector<2x32xf32>
    %54 = arith.mulf %47, %23 : vector<2x32xf32>
    %55 = arith.addf %53, %54 : vector<2x32xf32>
    %c0_i32 = arith.constant 0 : i32
    %56 = vector.broadcast %c0_i32 : i32 to vector<2x1xi32>
    %57 = arith.cmpi sgt, %0, %56 : vector<2x1xi32>
    %58 = vector.shape_cast %57 : vector<2x1xi1> to vector<2x1xi1>
    %59 = vector.broadcast %58 : vector<2x1xi1> to vector<2x32xi1>
    %60 = arith.select %59, %55, %23 : vector<2x32xi1>, vector<2x32xf32>
    %61 = vector.extract_strided_slice %12 {offsets = [2, 0], sizes = [2, 32], strides = [1, 1]} : vector<16x32xf32> to vector<2x32xf32>
    %62 = vector.extract_strided_slice %17 {offsets = [2, 0], sizes = [2, 32], strides = [1, 1]} : vector<16x32xf32> to vector<2x32xf32>
    %63 = vector.extract_strided_slice %22 {offsets = [2, 0], sizes = [2, 32], strides = [1, 1]} : vector<16x32xf32> to vector<2x32xf32>
    %cst_36 = arith.constant dense<0.000000e+00> : vector<2x32xf32>
    %64 = tpu.matmul %60, %1, %cst_36 {dimension_numbers = #tpu.dot_dimension_numbers<[1], [0], [0], [1], [0, 0, 1, 1], [], []>} : vector<2x32xf32>, vector<32x32xf32>, vector<2x32xf32> -> vector<2x32xf32>
    %65 = vector.broadcast %4 : vector<1x32xf32> to vector<2x32xf32>
    %66 = arith.addf %64, %65 : vector<2x32xf32>
    %cst_37 = arith.constant dense<0.000000e+00> : vector<2x32xf32>
    %67 = tpu.matmul %60, %2, %cst_37 {dimension_numbers = #tpu.dot_dimension_numbers<[1], [0], [0], [1], [0, 0, 1, 1], [], []>} : vector<2x32xf32>, vector<32x32xf32>, vector<2x32xf32> -> vector<2x32xf32>
    %68 = vector.broadcast %5 : vector<1x32xf32> to vector<2x32xf32>
    %69 = arith.addf %67, %68 : vector<2x32xf32>
    %cst_38 = arith.constant dense<0.000000e+00> : vector<2x32xf32>
    %70 = tpu.matmul %60, %3, %cst_38 {dimension_numbers = #tpu.dot_dimension_numbers<[1], [0], [0], [1], [0, 0, 1, 1], [], []>} : vector<2x32xf32>, vector<32x32xf32>, vector<2x32xf32> -> vector<2x32xf32>
    %71 = vector.broadcast %6 : vector<1x32xf32> to vector<2x32xf32>
    %72 = arith.addf %70, %71 : vector<2x32xf32>
    %73 = arith.addf %61, %66 : vector<2x32xf32>
    %74 = arith.negf %73 : vector<2x32xf32>
    %75 = math.exp %74 : vector<2x32xf32>
    %cst_39 = arith.constant 1.000000e+00 : f32
    %76 = vector.broadcast %cst_39 : f32 to vector<2x32xf32>
    %77 = arith.addf %76, %75 : vector<2x32xf32>
    %78 = arith.divf %76, %77 : vector<2x32xf32>
    %79 = arith.addf %62, %69 : vector<2x32xf32>
    %80 = arith.negf %79 : vector<2x32xf32>
    %81 = math.exp %80 : vector<2x32xf32>
    %cst_40 = arith.constant 1.000000e+00 : f32
    %82 = vector.broadcast %cst_40 : f32 to vector<2x32xf32>
    %83 = arith.addf %82, %81 : vector<2x32xf32>
    %84 = arith.divf %82, %83 : vector<2x32xf32>
    %85 = arith.mulf %78, %72 : vector<2x32xf32>
    %86 = arith.addf %63, %85 : vector<2x32xf32>
    %87 = math.tanh %86 : vector<2x32xf32>
    %cst_41 = arith.constant 1.000000e+00 : f32
    %88 = vector.broadcast %cst_41 : f32 to vector<2x32xf32>
    %89 = arith.subf %88, %84 : vector<2x32xf32>
    %90 = arith.mulf %89, %87 : vector<2x32xf32>
    %91 = arith.mulf %84, %60 : vector<2x32xf32>
    %92 = arith.addf %90, %91 : vector<2x32xf32>
    %c1_i32 = arith.constant 1 : i32
    %93 = vector.broadcast %c1_i32 : i32 to vector<2x1xi32>
    %94 = arith.cmpi sgt, %0, %93 : vector<2x1xi32>
    %95 = vector.shape_cast %94 : vector<2x1xi1> to vector<2x1xi1>
    %96 = vector.broadcast %95 : vector<2x1xi1> to vector<2x32xi1>
    %97 = arith.select %96, %92, %60 : vector<2x32xi1>, vector<2x32xf32>
    %98 = vector.extract_strided_slice %12 {offsets = [4, 0], sizes = [2, 32], strides = [1, 1]} : vector<16x32xf32> to vector<2x32xf32>
    %99 = vector.extract_strided_slice %17 {offsets = [4, 0], sizes = [2, 32], strides = [1, 1]} : vector<16x32xf32> to vector<2x32xf32>
    %100 = vector.extract_strided_slice %22 {offsets = [4, 0], sizes = [2, 32], strides = [1, 1]} : vector<16x32xf32> to vector<2x32xf32>
    %cst_42 = arith.constant dense<0.000000e+00> : vector<2x32xf32>
    %101 = tpu.matmul %97, %1, %cst_42 {dimension_numbers = #tpu.dot_dimension_numbers<[1], [0], [0], [1], [0, 0, 1, 1], [], []>} : vector<2x32xf32>, vector<32x32xf32>, vector<2x32xf32> -> vector<2x32xf32>
    %102 = vector.broadcast %4 : vector<1x32xf32> to vector<2x32xf32>
    %103 = arith.addf %101, %102 : vector<2x32xf32>
    %cst_43 = arith.constant dense<0.000000e+00> : vector<2x32xf32>
    %104 = tpu.matmul %97, %2, %cst_43 {dimension_numbers = #tpu.dot_dimension_numbers<[1], [0], [0], [1], [0, 0, 1, 1], [], []>} : vector<2x32xf32>, vector<32x32xf32>, vector<2x32xf32> -> vector<2x32xf32>
    %105 = vector.broadcast %5 : vector<1x32xf32> to vector<2x32xf32>
    %106 = arith.addf %104, %105 : vector<2x32xf32>
    %cst_44 = arith.constant dense<0.000000e+00> : vector<2x32xf32>
    %107 = tpu.matmul %97, %3, %cst_44 {dimension_numbers = #tpu.dot_dimension_numbers<[1], [0], [0], [1], [0, 0, 1, 1], [], []>} : vector<2x32xf32>, vector<32x32xf32>, vector<2x32xf32> -> vector<2x32xf32>
    %108 = vector.broadcast %6 : vector<1x32xf32> to vector<2x32xf32>
    %109 = arith.addf %107, %108 : vector<2x32xf32>
    %110 = arith.addf %98, %103 : vector<2x32xf32>
    %111 = arith.negf %110 : vector<2x32xf32>
    %112 = math.exp %111 : vector<2x32xf32>
    %cst_45 = arith.constant 1.000000e+00 : f32
    %113 = vector.broadcast %cst_45 : f32 to vector<2x32xf32>
    %114 = arith.addf %113, %112 : vector<2x32xf32>
    %115 = arith.divf %113, %114 : vector<2x32xf32>
    %116 = arith.addf %99, %106 : vector<2x32xf32>
    %117 = arith.negf %116 : vector<2x32xf32>
    %118 = math.exp %117 : vector<2x32xf32>
    %cst_46 = arith.constant 1.000000e+00 : f32
    %119 = vector.broadcast %cst_46 : f32 to vector<2x32xf32>
    %120 = arith.addf %119, %118 : vector<2x32xf32>
    %121 = arith.divf %119, %120 : vector<2x32xf32>
    %122 = arith.mulf %115, %109 : vector<2x32xf32>
    %123 = arith.addf %100, %122 : vector<2x32xf32>
    %124 = math.tanh %123 : vector<2x32xf32>
    %cst_47 = arith.constant 1.000000e+00 : f32
    %125 = vector.broadcast %cst_47 : f32 to vector<2x32xf32>
    %126 = arith.subf %125, %121 : vector<2x32xf32>
    %127 = arith.mulf %126, %124 : vector<2x32xf32>
    %128 = arith.mulf %121, %97 : vector<2x32xf32>
    %129 = arith.addf %127, %128 : vector<2x32xf32>
    %c2_i32 = arith.constant 2 : i32
    %130 = vector.broadcast %c2_i32 : i32 to vector<2x1xi32>
    %131 = arith.cmpi sgt, %0, %130 : vector<2x1xi32>
    %132 = vector.shape_cast %131 : vector<2x1xi1> to vector<2x1xi1>
    %133 = vector.broadcast %132 : vector<2x1xi1> to vector<2x32xi1>
    %134 = arith.select %133, %129, %97 : vector<2x32xi1>, vector<2x32xf32>
    %135 = vector.extract_strided_slice %12 {offsets = [6, 0], sizes = [2, 32], strides = [1, 1]} : vector<16x32xf32> to vector<2x32xf32>
    %136 = vector.extract_strided_slice %17 {offsets = [6, 0], sizes = [2, 32], strides = [1, 1]} : vector<16x32xf32> to vector<2x32xf32>
    %137 = vector.extract_strided_slice %22 {offsets = [6, 0], sizes = [2, 32], strides = [1, 1]} : vector<16x32xf32> to vector<2x32xf32>
    %cst_48 = arith.constant dense<0.000000e+00> : vector<2x32xf32>
    %138 = tpu.matmul %134, %1, %cst_48 {dimension_numbers = #tpu.dot_dimension_numbers<[1], [0], [0], [1], [0, 0, 1, 1], [], []>} : vector<2x32xf32>, vector<32x32xf32>, vector<2x32xf32> -> vector<2x32xf32>
    %139 = vector.broadcast %4 : vector<1x32xf32> to vector<2x32xf32>
    %140 = arith.addf %138, %139 : vector<2x32xf32>
    %cst_49 = arith.constant dense<0.000000e+00> : vector<2x32xf32>
    %141 = tpu.matmul %134, %2, %cst_49 {dimension_numbers = #tpu.dot_dimension_numbers<[1], [0], [0], [1], [0, 0, 1, 1], [], []>} : vector<2x32xf32>, vector<32x32xf32>, vector<2x32xf32> -> vector<2x32xf32>
    %142 = vector.broadcast %5 : vector<1x32xf32> to vector<2x32xf32>
    %143 = arith.addf %141, %142 : vector<2x32xf32>
    %cst_50 = arith.constant dense<0.000000e+00> : vector<2x32xf32>
    %144 = tpu.matmul %134, %3, %cst_50 {dimension_numbers = #tpu.dot_dimension_numbers<[1], [0], [0], [1], [0, 0, 1, 1], [], []>} : vector<2x32xf32>, vector<32x32xf32>, vector<2x32xf32> -> vector<2x32xf32>
    %145 = vector.broadcast %6 : vector<1x32xf32> to vector<2x32xf32>
    %146 = arith.addf %144, %145 : vector<2x32xf32>
    %147 = arith.addf %135, %140 : vector<2x32xf32>
    %148 = arith.negf %147 : vector<2x32xf32>
    %149 = math.exp %148 : vector<2x32xf32>
    %cst_51 = arith.constant 1.000000e+00 : f32
    %150 = vector.broadcast %cst_51 : f32 to vector<2x32xf32>
    %151 = arith.addf %150, %149 : vector<2x32xf32>
    %152 = arith.divf %150, %151 : vector<2x32xf32>
    %153 = arith.addf %136, %143 : vector<2x32xf32>
    %154 = arith.negf %153 : vector<2x32xf32>
    %155 = math.exp %154 : vector<2x32xf32>
    %cst_52 = arith.constant 1.000000e+00 : f32
    %156 = vector.broadcast %cst_52 : f32 to vector<2x32xf32>
    %157 = arith.addf %156, %155 : vector<2x32xf32>
    %158 = arith.divf %156, %157 : vector<2x32xf32>
    %159 = arith.mulf %152, %146 : vector<2x32xf32>
    %160 = arith.addf %137, %159 : vector<2x32xf32>
    %161 = math.tanh %160 : vector<2x32xf32>
    %cst_53 = arith.constant 1.000000e+00 : f32
    %162 = vector.broadcast %cst_53 : f32 to vector<2x32xf32>
    %163 = arith.subf %162, %158 : vector<2x32xf32>
    %164 = arith.mulf %163, %161 : vector<2x32xf32>
    %165 = arith.mulf %158, %134 : vector<2x32xf32>
    %166 = arith.addf %164, %165 : vector<2x32xf32>
    %c3_i32 = arith.constant 3 : i32
    %167 = vector.broadcast %c3_i32 : i32 to vector<2x1xi32>
    %168 = arith.cmpi sgt, %0, %167 : vector<2x1xi32>
    %169 = vector.shape_cast %168 : vector<2x1xi1> to vector<2x1xi1>
    %170 = vector.broadcast %169 : vector<2x1xi1> to vector<2x32xi1>
    %171 = arith.select %170, %166, %134 : vector<2x32xi1>, vector<2x32xf32>
    %172 = vector.extract_strided_slice %12 {offsets = [8, 0], sizes = [2, 32], strides = [1, 1]} : vector<16x32xf32> to vector<2x32xf32>
    %173 = vector.extract_strided_slice %17 {offsets = [8, 0], sizes = [2, 32], strides = [1, 1]} : vector<16x32xf32> to vector<2x32xf32>
    %174 = vector.extract_strided_slice %22 {offsets = [8, 0], sizes = [2, 32], strides = [1, 1]} : vector<16x32xf32> to vector<2x32xf32>
    %cst_54 = arith.constant dense<0.000000e+00> : vector<2x32xf32>
    %175 = tpu.matmul %171, %1, %cst_54 {dimension_numbers = #tpu.dot_dimension_numbers<[1], [0], [0], [1], [0, 0, 1, 1], [], []>} : vector<2x32xf32>, vector<32x32xf32>, vector<2x32xf32> -> vector<2x32xf32>
    %176 = vector.broadcast %4 : vector<1x32xf32> to vector<2x32xf32>
    %177 = arith.addf %175, %176 : vector<2x32xf32>
    %cst_55 = arith.constant dense<0.000000e+00> : vector<2x32xf32>
    %178 = tpu.matmul %171, %2, %cst_55 {dimension_numbers = #tpu.dot_dimension_numbers<[1], [0], [0], [1], [0, 0, 1, 1], [], []>} : vector<2x32xf32>, vector<32x32xf32>, vector<2x32xf32> -> vector<2x32xf32>
    %179 = vector.broadcast %5 : vector<1x32xf32> to vector<2x32xf32>
    %180 = arith.addf %178, %179 : vector<2x32xf32>
    %cst_56 = arith.constant dense<0.000000e+00> : vector<2x32xf32>
    %181 = tpu.matmul %171, %3, %cst_56 {dimension_numbers = #tpu.dot_dimension_numbers<[1], [0], [0], [1], [0, 0, 1, 1], [], []>} : vector<2x32xf32>, vector<32x32xf32>, vector<2x32xf32> -> vector<2x32xf32>
    %182 = vector.broadcast %6 : vector<1x32xf32> to vector<2x32xf32>
    %183 = arith.addf %181, %182 : vector<2x32xf32>
    %184 = arith.addf %172, %177 : vector<2x32xf32>
    %185 = arith.negf %184 : vector<2x32xf32>
    %186 = math.exp %185 : vector<2x32xf32>
    %cst_57 = arith.constant 1.000000e+00 : f32
    %187 = vector.broadcast %cst_57 : f32 to vector<2x32xf32>
    %188 = arith.addf %187, %186 : vector<2x32xf32>
    %189 = arith.divf %187, %188 : vector<2x32xf32>
    %190 = arith.addf %173, %180 : vector<2x32xf32>
    %191 = arith.negf %190 : vector<2x32xf32>
    %192 = math.exp %191 : vector<2x32xf32>
    %cst_58 = arith.constant 1.000000e+00 : f32
    %193 = vector.broadcast %cst_58 : f32 to vector<2x32xf32>
    %194 = arith.addf %193, %192 : vector<2x32xf32>
    %195 = arith.divf %193, %194 : vector<2x32xf32>
    %196 = arith.mulf %189, %183 : vector<2x32xf32>
    %197 = arith.addf %174, %196 : vector<2x32xf32>
    %198 = math.tanh %197 : vector<2x32xf32>
    %cst_59 = arith.constant 1.000000e+00 : f32
    %199 = vector.broadcast %cst_59 : f32 to vector<2x32xf32>
    %200 = arith.subf %199, %195 : vector<2x32xf32>
    %201 = arith.mulf %200, %198 : vector<2x32xf32>
    %202 = arith.mulf %195, %171 : vector<2x32xf32>
    %203 = arith.addf %201, %202 : vector<2x32xf32>
    %c4_i32 = arith.constant 4 : i32
    %204 = vector.broadcast %c4_i32 : i32 to vector<2x1xi32>
    %205 = arith.cmpi sgt, %0, %204 : vector<2x1xi32>
    %206 = vector.shape_cast %205 : vector<2x1xi1> to vector<2x1xi1>
    %207 = vector.broadcast %206 : vector<2x1xi1> to vector<2x32xi1>
    %208 = arith.select %207, %203, %171 : vector<2x32xi1>, vector<2x32xf32>
    %209 = vector.extract_strided_slice %12 {offsets = [10, 0], sizes = [2, 32], strides = [1, 1]} : vector<16x32xf32> to vector<2x32xf32>
    %210 = vector.extract_strided_slice %17 {offsets = [10, 0], sizes = [2, 32], strides = [1, 1]} : vector<16x32xf32> to vector<2x32xf32>
    %211 = vector.extract_strided_slice %22 {offsets = [10, 0], sizes = [2, 32], strides = [1, 1]} : vector<16x32xf32> to vector<2x32xf32>
    %cst_60 = arith.constant dense<0.000000e+00> : vector<2x32xf32>
    %212 = tpu.matmul %208, %1, %cst_60 {dimension_numbers = #tpu.dot_dimension_numbers<[1], [0], [0], [1], [0, 0, 1, 1], [], []>} : vector<2x32xf32>, vector<32x32xf32>, vector<2x32xf32> -> vector<2x32xf32>
    %213 = vector.broadcast %4 : vector<1x32xf32> to vector<2x32xf32>
    %214 = arith.addf %212, %213 : vector<2x32xf32>
    %cst_61 = arith.constant dense<0.000000e+00> : vector<2x32xf32>
    %215 = tpu.matmul %208, %2, %cst_61 {dimension_numbers = #tpu.dot_dimension_numbers<[1], [0], [0], [1], [0, 0, 1, 1], [], []>} : vector<2x32xf32>, vector<32x32xf32>, vector<2x32xf32> -> vector<2x32xf32>
    %216 = vector.broadcast %5 : vector<1x32xf32> to vector<2x32xf32>
    %217 = arith.addf %215, %216 : vector<2x32xf32>
    %cst_62 = arith.constant dense<0.000000e+00> : vector<2x32xf32>
    %218 = tpu.matmul %208, %3, %cst_62 {dimension_numbers = #tpu.dot_dimension_numbers<[1], [0], [0], [1], [0, 0, 1, 1], [], []>} : vector<2x32xf32>, vector<32x32xf32>, vector<2x32xf32> -> vector<2x32xf32>
    %219 = vector.broadcast %6 : vector<1x32xf32> to vector<2x32xf32>
    %220 = arith.addf %218, %219 : vector<2x32xf32>
    %221 = arith.addf %209, %214 : vector<2x32xf32>
    %222 = arith.negf %221 : vector<2x32xf32>
    %223 = math.exp %222 : vector<2x32xf32>
    %cst_63 = arith.constant 1.000000e+00 : f32
    %224 = vector.broadcast %cst_63 : f32 to vector<2x32xf32>
    %225 = arith.addf %224, %223 : vector<2x32xf32>
    %226 = arith.divf %224, %225 : vector<2x32xf32>
    %227 = arith.addf %210, %217 : vector<2x32xf32>
    %228 = arith.negf %227 : vector<2x32xf32>
    %229 = math.exp %228 : vector<2x32xf32>
    %cst_64 = arith.constant 1.000000e+00 : f32
    %230 = vector.broadcast %cst_64 : f32 to vector<2x32xf32>
    %231 = arith.addf %230, %229 : vector<2x32xf32>
    %232 = arith.divf %230, %231 : vector<2x32xf32>
    %233 = arith.mulf %226, %220 : vector<2x32xf32>
    %234 = arith.addf %211, %233 : vector<2x32xf32>
    %235 = math.tanh %234 : vector<2x32xf32>
    %cst_65 = arith.constant 1.000000e+00 : f32
    %236 = vector.broadcast %cst_65 : f32 to vector<2x32xf32>
    %237 = arith.subf %236, %232 : vector<2x32xf32>
    %238 = arith.mulf %237, %235 : vector<2x32xf32>
    %239 = arith.mulf %232, %208 : vector<2x32xf32>
    %240 = arith.addf %238, %239 : vector<2x32xf32>
    %c5_i32 = arith.constant 5 : i32
    %241 = vector.broadcast %c5_i32 : i32 to vector<2x1xi32>
    %242 = arith.cmpi sgt, %0, %241 : vector<2x1xi32>
    %243 = vector.shape_cast %242 : vector<2x1xi1> to vector<2x1xi1>
    %244 = vector.broadcast %243 : vector<2x1xi1> to vector<2x32xi1>
    %245 = arith.select %244, %240, %208 : vector<2x32xi1>, vector<2x32xf32>
    %246 = vector.extract_strided_slice %12 {offsets = [12, 0], sizes = [2, 32], strides = [1, 1]} : vector<16x32xf32> to vector<2x32xf32>
    %247 = vector.extract_strided_slice %17 {offsets = [12, 0], sizes = [2, 32], strides = [1, 1]} : vector<16x32xf32> to vector<2x32xf32>
    %248 = vector.extract_strided_slice %22 {offsets = [12, 0], sizes = [2, 32], strides = [1, 1]} : vector<16x32xf32> to vector<2x32xf32>
    %cst_66 = arith.constant dense<0.000000e+00> : vector<2x32xf32>
    %249 = tpu.matmul %245, %1, %cst_66 {dimension_numbers = #tpu.dot_dimension_numbers<[1], [0], [0], [1], [0, 0, 1, 1], [], []>} : vector<2x32xf32>, vector<32x32xf32>, vector<2x32xf32> -> vector<2x32xf32>
    %250 = vector.broadcast %4 : vector<1x32xf32> to vector<2x32xf32>
    %251 = arith.addf %249, %250 : vector<2x32xf32>
    %cst_67 = arith.constant dense<0.000000e+00> : vector<2x32xf32>
    %252 = tpu.matmul %245, %2, %cst_67 {dimension_numbers = #tpu.dot_dimension_numbers<[1], [0], [0], [1], [0, 0, 1, 1], [], []>} : vector<2x32xf32>, vector<32x32xf32>, vector<2x32xf32> -> vector<2x32xf32>
    %253 = vector.broadcast %5 : vector<1x32xf32> to vector<2x32xf32>
    %254 = arith.addf %252, %253 : vector<2x32xf32>
    %cst_68 = arith.constant dense<0.000000e+00> : vector<2x32xf32>
    %255 = tpu.matmul %245, %3, %cst_68 {dimension_numbers = #tpu.dot_dimension_numbers<[1], [0], [0], [1], [0, 0, 1, 1], [], []>} : vector<2x32xf32>, vector<32x32xf32>, vector<2x32xf32> -> vector<2x32xf32>
    %256 = vector.broadcast %6 : vector<1x32xf32> to vector<2x32xf32>
    %257 = arith.addf %255, %256 : vector<2x32xf32>
    %258 = arith.addf %246, %251 : vector<2x32xf32>
    %259 = arith.negf %258 : vector<2x32xf32>
    %260 = math.exp %259 : vector<2x32xf32>
    %cst_69 = arith.constant 1.000000e+00 : f32
    %261 = vector.broadcast %cst_69 : f32 to vector<2x32xf32>
    %262 = arith.addf %261, %260 : vector<2x32xf32>
    %263 = arith.divf %261, %262 : vector<2x32xf32>
    %264 = arith.addf %247, %254 : vector<2x32xf32>
    %265 = arith.negf %264 : vector<2x32xf32>
    %266 = math.exp %265 : vector<2x32xf32>
    %cst_70 = arith.constant 1.000000e+00 : f32
    %267 = vector.broadcast %cst_70 : f32 to vector<2x32xf32>
    %268 = arith.addf %267, %266 : vector<2x32xf32>
    %269 = arith.divf %267, %268 : vector<2x32xf32>
    %270 = arith.mulf %263, %257 : vector<2x32xf32>
    %271 = arith.addf %248, %270 : vector<2x32xf32>
    %272 = math.tanh %271 : vector<2x32xf32>
    %cst_71 = arith.constant 1.000000e+00 : f32
    %273 = vector.broadcast %cst_71 : f32 to vector<2x32xf32>
    %274 = arith.subf %273, %269 : vector<2x32xf32>
    %275 = arith.mulf %274, %272 : vector<2x32xf32>
    %276 = arith.mulf %269, %245 : vector<2x32xf32>
    %277 = arith.addf %275, %276 : vector<2x32xf32>
    %c6_i32 = arith.constant 6 : i32
    %278 = vector.broadcast %c6_i32 : i32 to vector<2x1xi32>
    %279 = arith.cmpi sgt, %0, %278 : vector<2x1xi32>
    %280 = vector.shape_cast %279 : vector<2x1xi1> to vector<2x1xi1>
    %281 = vector.broadcast %280 : vector<2x1xi1> to vector<2x32xi1>
    %282 = arith.select %281, %277, %245 : vector<2x32xi1>, vector<2x32xf32>
    %283 = vector.extract_strided_slice %12 {offsets = [14, 0], sizes = [2, 32], strides = [1, 1]} : vector<16x32xf32> to vector<2x32xf32>
    %284 = vector.extract_strided_slice %17 {offsets = [14, 0], sizes = [2, 32], strides = [1, 1]} : vector<16x32xf32> to vector<2x32xf32>
    %285 = vector.extract_strided_slice %22 {offsets = [14, 0], sizes = [2, 32], strides = [1, 1]} : vector<16x32xf32> to vector<2x32xf32>
    %cst_72 = arith.constant dense<0.000000e+00> : vector<2x32xf32>
    %286 = tpu.matmul %282, %1, %cst_72 {dimension_numbers = #tpu.dot_dimension_numbers<[1], [0], [0], [1], [0, 0, 1, 1], [], []>} : vector<2x32xf32>, vector<32x32xf32>, vector<2x32xf32> -> vector<2x32xf32>
    %287 = vector.broadcast %4 : vector<1x32xf32> to vector<2x32xf32>
    %288 = arith.addf %286, %287 : vector<2x32xf32>
    %cst_73 = arith.constant dense<0.000000e+00> : vector<2x32xf32>
    %289 = tpu.matmul %282, %2, %cst_73 {dimension_numbers = #tpu.dot_dimension_numbers<[1], [0], [0], [1], [0, 0, 1, 1], [], []>} : vector<2x32xf32>, vector<32x32xf32>, vector<2x32xf32> -> vector<2x32xf32>
    %290 = vector.broadcast %5 : vector<1x32xf32> to vector<2x32xf32>
    %291 = arith.addf %289, %290 : vector<2x32xf32>
    %cst_74 = arith.constant dense<0.000000e+00> : vector<2x32xf32>
    %292 = tpu.matmul %282, %3, %cst_74 {dimension_numbers = #tpu.dot_dimension_numbers<[1], [0], [0], [1], [0, 0, 1, 1], [], []>} : vector<2x32xf32>, vector<32x32xf32>, vector<2x32xf32> -> vector<2x32xf32>
    %293 = vector.broadcast %6 : vector<1x32xf32> to vector<2x32xf32>
    %294 = arith.addf %292, %293 : vector<2x32xf32>
    %295 = arith.addf %283, %288 : vector<2x32xf32>
    %296 = arith.negf %295 : vector<2x32xf32>
    %297 = math.exp %296 : vector<2x32xf32>
    %cst_75 = arith.constant 1.000000e+00 : f32
    %298 = vector.broadcast %cst_75 : f32 to vector<2x32xf32>
    %299 = arith.addf %298, %297 : vector<2x32xf32>
    %300 = arith.divf %298, %299 : vector<2x32xf32>
    %301 = arith.addf %284, %291 : vector<2x32xf32>
    %302 = arith.negf %301 : vector<2x32xf32>
    %303 = math.exp %302 : vector<2x32xf32>
    %cst_76 = arith.constant 1.000000e+00 : f32
    %304 = vector.broadcast %cst_76 : f32 to vector<2x32xf32>
    %305 = arith.addf %304, %303 : vector<2x32xf32>
    %306 = arith.divf %304, %305 : vector<2x32xf32>
    %307 = arith.mulf %300, %294 : vector<2x32xf32>
    %308 = arith.addf %285, %307 : vector<2x32xf32>
    %309 = math.tanh %308 : vector<2x32xf32>
    %cst_77 = arith.constant 1.000000e+00 : f32
    %310 = vector.broadcast %cst_77 : f32 to vector<2x32xf32>
    %311 = arith.subf %310, %306 : vector<2x32xf32>
    %312 = arith.mulf %311, %309 : vector<2x32xf32>
    %313 = arith.mulf %306, %282 : vector<2x32xf32>
    %314 = arith.addf %312, %313 : vector<2x32xf32>
    %c7_i32 = arith.constant 7 : i32
    %315 = vector.broadcast %c7_i32 : i32 to vector<2x1xi32>
    %316 = arith.cmpi sgt, %0, %315 : vector<2x1xi32>
    %317 = vector.shape_cast %316 : vector<2x1xi1> to vector<2x1xi1>
    %318 = vector.broadcast %317 : vector<2x1xi1> to vector<2x32xi1>
    %319 = arith.select %318, %314, %282 : vector<2x32xi1>, vector<2x32xf32>
    %c0_78 = arith.constant 0 : index
    %c0_79 = arith.constant 0 : index
    %320 = vector.load %arg14[%c0_78, %c0_79] : memref<1x32xf32, #tpu.memory_space<vmem>>, vector<1x32xf32>
    %321 = vector.broadcast %320 : vector<1x32xf32> to vector<2x32xf32>
    %322 = arith.mulf %319, %321 : vector<2x32xf32>
    %cst_80 = arith.constant dense<0.000000e+00> : vector<2xf32>
    %323 = vector.multi_reduction <add>, %322, %cst_80 [1] : vector<2x32xf32> to vector<2xf32>
    %324 = vector.shape_cast %323 : vector<2xf32> to vector<2x1xf32>
    %c0_81 = arith.constant 0 : index
    %c0_82 = arith.constant 0 : index
    %325 = vector.load %arg15[%c0_81, %c0_82] : memref<1x1xf32, #tpu.memory_space<vmem>>, vector<1x1xf32>
    %326 = vector.broadcast %325 : vector<1x1xf32> to vector<2x1xf32>
    %327 = arith.addf %324, %326 : vector<2x1xf32>
    %c0_83 = arith.constant 0 : index
    %c0_84 = arith.constant 0 : index
    %328 = vector.load %arg16[%c0_83, %c0_84] : memref<2x1xf32, #tpu.memory_space<vmem>>, vector<2x1xf32>
    tpu.vector_store %arg16[%c0_83, %c0_84], %327 {strides = array<i32>} : memref<2x1xf32, #tpu.memory_space<vmem>>, vector<2x1xf32>,
    return
  }
}

</mosaic_0001>

<bundles_post_ra>
// kernel: tpu_custom_call.1
= control target key start
LH: loop header
LB: loop body
LE: loop exit
PB: predicated region body
PF: predicated region fallthrough
CT: control target
= control target key end

     0   :  { %s3694_s0 = inlined_call_operand.vmem [shape: f32[16,8], index: 0, kind: input, shape index: {}]   ;;  %s3695_s1 = inlined_call_operand.vmem [shape: s32[2,1], index: 1, kind: input, shape index: {}]   ;;  %s3696_s2 = inlined_call_operand.hbm [shape: f32[8,32], index: 2, kind: input, shape index: {}]   ;;  %s3697_s3 = inlined_call_operand.hbm [shape: f32[8,32], index: 3, kind: input, shape index: {}]   ;;  %s3698_s4 = inlined_call_operand.hbm [shape: f32[8,32], index: 4, kind: input, shape index: {}]   ;;  %s3699_s5 = inlined_call_operand.vmem [shape: f32[32,32], index: 5, kind: input, shape index: {}]   ;;  %s3700_s6 = inlined_call_operand.hbm [shape: f32[32,32], index: 6, kind: input, shape index: {}]   ;;  %s3701_s7 = inlined_call_operand.hbm [shape: f32[32,32], index: 7, kind: input, shape index: {}]   ;;  %s3702_s8 = inlined_call_operand.vmem [shape: f32[1,32], index: 8, kind: input, shape index: {}]   ;;  %s3703_s9 = inlined_call_operand.vmem [shape: f32[1,32], index: 9, kind: input, shape index: {}]   ;;  %s3704_s10 = inlined_call_operand.vmem [shape: f32[1,32], index: 10, kind: input, shape index: {}]   ;;  %s3705_s11 = inlined_call_operand.vmem [shape: f32[1,32], index: 11, kind: input, shape index: {}]   ;;  %s3706_s12 = inlined_call_operand.vmem [shape: f32[1,32], index: 12, kind: input, shape index: {}]   ;;  %s3707_s13 = inlined_call_operand.vmem [shape: f32[1,32], index: 13, kind: input, shape index: {}]   ;;  %s3708_s14 = inlined_call_operand.vmem [shape: f32[1,32], index: 14, kind: input, shape index: {}]   ;;  %s3709_s15 = inlined_call_operand.<no memory space> [shape: f32[1,1], index: 15, kind: input, shape index: {}]   ;;  %s3710_s16 = inlined_call_operand.vmem [shape: f32[2,1], index: 16, kind: output, shape index: {}]  }
   0x1   :  { %3712 = sst [smem:[#allocation14_spill]] %s3694_s0  ;;  %v21_v0 = vstv %s3709_s15 }
   0x2   :  { %22 = vst [vmem:[#allocation2] sm:$0x1] %v21_v0 }
   0x3   :  { %23 = vsyncpa [#allocation4], 0 }
   0x4   :  { %24 = vsyncpa [#allocation6], 0 }
   0x5   :  { %25 = vsyncpa [#allocation9], 0  ;;  %s3112_s23 = smov [#allocation5]   ;;  %s3113_s25 = smov [#allocation8]  }
   0x6   :  { %s46_s24 = sshll.u32 %s3112_s23, 4  ;;  %s67_s26 = sshll.u32 %s3113_s25, 4  ;;  %s47_s24 = int_to_ptr.vmem [resolvable:$true] %s46_s24  ;;  %s68_s26 = int_to_ptr.vmem [resolvable:$true] %s67_s26 }
   0x7   :  { %s3014_s27 = scalar_lea.vmem %s47_s24, 128  ;;  %p3019_p1 = scmp.lt.s32.totalorder %s47_s24, %s47_s24 }
   0x8   :  { %p3015_p0 = scmp.ne.s32.totalorder %s47_s24, %s3014_s27  ;;  %p3020_p2 = scmp.lt.s32.totalorder %s3014_s27, %s3014_s27 }
   0xa   :  { %p3021_p3 = por %p3020_p2, %p3019_p1 }
   0xc   :  { %p3022_p4 = pnand %p3021_p3, %p3015_p0 }
   0xe   :  { %3025 = shalt.err (!%p3022_p4)
}
   0xf   :  { %49 = dma.hbm_to_vmem [thread:$0]  %s3697_s3, 128, %s47_s24, [#allocation6]  }
  0x10   :  { %s3034_s15 = scalar_lea.vmem %s68_s26, 512  ;;  %p3039_p6 = scmp.lt.s32.totalorder %s68_s26, %s68_s26 }
  0x11   :  { %p3035_p5 = scmp.ne.s32.totalorder %s68_s26, %s3034_s15  ;;  %p3040_p7 = scmp.lt.s32.totalorder %s3034_s15, %s3034_s15 }
  0x13   :  { %p3041_p8 = por %p3040_p7, %p3039_p6 }
  0x15   :  { %p3042_p9 = pnand %p3041_p8, %p3035_p5 }
  0x17   :  { %3045 = shalt.err (!%p3042_p9)
}
  0x18   :  { %s3114_s30 = smov 128   ;;  %s3115_s0 = smov 8  }
  0x19   :  { %73 = dma.hbm_to_vmem [thread:$0]  %s3700_s6, 512, %s68_s26, [#allocation9], %s3114_s30, %s3114_s30, %s3115_s0  }
  0x1a   :  { %s3116_s19 = smov [#allocation3]   ;;  %s3117_s21 = smov [#allocation7]  }
  0x1b   :  { %s36_s20 = sshll.u32 %s3116_s19, 4  ;;  %s56_s3 = sshll.u32 %s3117_s21, 4  ;;  %s37_s20 = int_to_ptr.vmem [resolvable:$true] %s36_s20  ;;  %s57_s3 = int_to_ptr.vmem [resolvable:$true] %s56_s3 }
  0x1c   :  { %s3054_s22 = scalar_lea.vmem %s37_s20, 128  ;;  %p3059_p11 = scmp.lt.s32.totalorder %s37_s20, %s37_s20 }
  0x1d   :  { %p3055_p10 = scmp.ne.s32.totalorder %s37_s20, %s3054_s22  ;;  %p3060_p12 = scmp.lt.s32.totalorder %s3054_s22, %s3054_s22 }
  0x1f   :  { %p3061_p13 = por %p3060_p12, %p3059_p11 }
  0x21   :  { %p3062_p0 = pnand %p3061_p13, %p3055_p10 }
  0x23   :  { %3065 = shalt.err (!%p3062_p0)
}
  0x24   :  { %39 = dma.hbm_to_vmem [thread:$0]  %s3696_s2, 128, %s37_s20, [#allocation4]  }
  0x25   :  { %s3074_s25 = scalar_lea.vmem %s57_s3, 128  ;;  %p3079_p2 = scmp.lt.s32.totalorder %s57_s3, %s57_s3 }
  0x26   :  { %p3075_p1 = scmp.ne.s32.totalorder %s57_s3, %s3074_s25  ;;  %p3080_p3 = scmp.lt.s32.totalorder %s3074_s25, %s3074_s25 }
  0x28   :  { %p3081_p4 = por %p3080_p3, %p3079_p2 }
  0x2a   :  { %p3082_p5 = pnand %p3081_p4, %p3075_p1 }
  0x2c   :  { %3085 = shalt.err (!%p3082_p5)
}
  0x2d   :  { %59 = dma.hbm_to_vmem [thread:$0]  %s3698_s4, 128, %s57_s3, [#allocation6]  }
  0x2e   :  { %s3118_s27 = smov [#allocation10]  }
  0x2f   :  { %s79_s28 = sshll.u32 %s3118_s27, 4  ;;  %s80_s28 = int_to_ptr.vmem [resolvable:$true] %s79_s28 }
  0x30   :  { %s3094_s29 = scalar_lea.vmem %s80_s28, 512  ;;  %p3099_p7 = scmp.lt.s32.totalorder %s80_s28, %s80_s28 }
  0x31   :  { %p3095_p6 = scmp.ne.s32.totalorder %s80_s28, %s3094_s29  ;;  %p3100_p8 = scmp.lt.s32.totalorder %s3094_s29, %s3094_s29 }
  0x33   :  { %p3101_p9 = por %p3100_p8, %p3099_p7 }
  0x35   :  { %p3102_p10 = pnand %p3101_p9, %p3095_p6 }
  0x37   :  { %3105 = shalt.err (!%p3102_p10)
}
  0x38   :  { %85 = dma.hbm_to_vmem [thread:$0]  %s3701_s7, 512, %s80_s28, [#allocation9], %s3114_s30, %s3114_s30, %s3115_s0  }
  0x39   :  { %3106 = dma.done.wait [#allocation4], 128  }
  0x3a   :  { %3107 = vsyncadd [#allocation4], 4294967168 }
  0x3b   :  { %3108 = dma.done.wait [#allocation6], 256  }
  0x3c   :  { %3109 = vsyncadd [#allocation6], 4294967040 }
  0x3d   :  { %3110 = dma.done.wait [#allocation9], 1024  }
  0x3e   :  { %3111 = vsyncadd [#allocation9], 4294966272  ;;  %v3119_v1 = vmov 0   ;;  %vm143_vm0 = vcmask 64512   ;;  %v135_v2 = vld [vmem:[#allocation3] sm:$0xff]  ;;  %v225_v3 = vld [vmem:[#allocation5] sm:$0xff] }
  0x3f   :  { %2920 = vset.pattern.permute.xlu0 %v3119_v1  ;;  %2921 = vset.pattern.permute.xlu1 %v3119_v1  ;;  %s3713_s18 = sld [smem:[#allocation14_spill]]  ;;  %v308_v6 = vld [vmem:[#allocation7] sm:$0xff]  ;;  %v3120_v8 = vmov 0.0   ;;  %v3262_v11 = vld [vmem:[%s3699_s5 + $0x8] sm:$0xff]  ;;  %v3273_v13 = vld [vmem:[%s3699_s5] sm:$0xff]  ;;  %vm3121_vm1 = vmmov 0  }
  0x40   :  { %2631 = vmatprep.subr.mxu0 %v135_v2  ;;  %2636 = vmatprep.subr.mxu1 %v225_v3  ;;  %v3244_v7 = vld [vmem:[%s3699_s5 + $0x18] sm:$0xff]  ;;  %v3252_v9 = vld [vmem:[%s3699_s5 + $0x10] sm:$0xff]  ;;  %v3280_v14 = vld [vmem:[%s3695_s1] sm:$0x3]  ;;  %vm397_vm7 = vcmask 261120  }
  0x41   :  { %2632 = vmatpush3.msra.mxu0 %v135_v2  ;;  %2637 = vmatpush3.msra.mxu1 %v225_v3  ;;  %v3257_v10 = vld [vmem:[#allocation8 + $0x18] sm:$0xff]  ;;  %v3268_v12 = vld [vmem:[#allocation8 + $0x10] sm:$0xff]  ;;  %v3284_v15 = vld [vmem:[#allocation8 + $0x8] sm:$0xff]  ;;  %vm644_vm2 = vcmp.gt.s32.totalorder %v3280_v14, 0  ;;  %vm896_vm3 = vcmp.gt.s32.totalorder %v3280_v14, 1  ;;  %vm1650_vm4 = vcmp.gt.s32.totalorder %v3280_v14, 4 }
  0x42   :  { %2646 = vmatprep.subr.mxu1 %v3120_v8  ;;  %2641 = vmatprep.subr.mxu0 %v308_v6  ;;  %v3291_v16 = vld [vmem:[#allocation8] sm:$0xff]  ;;  %v3296_v17 = vld [vmem:[#allocation10 + $0x18] sm:$0xff]  ;;  %v3303_v18 = vld [vmem:[#allocation10 + $0x10] sm:$0xff]  ;;  %v645_v19 = vsel %vm644_vm2, 1, %v3119_v1  ;;  %v897_v22 = vsel %vm896_vm3, 1, %v3119_v1  ;;  %v1651_v23 = vsel %vm1650_vm4, 1, %v3119_v1 }
  0x43   :  { %v3310_v20 = vld [vmem:[#allocation10 + $0x8] sm:$0xff]  ;;  %647 = vperm.xlu0 %2920, %v645_v19   ;;  %v3316_v21 = vld [vmem:[#allocation10] sm:$0xff]  ;;  %vm2157_vm5 = vcmp.gt.s32.totalorder %v3280_v14, 6  ;;  %vm1151_vm8 = vcmp.gt.s32.totalorder %v3280_v14, 2  ;;  %vm1406_vm9 = vcmp.gt.s32.totalorder %v3280_v14, 3  ;;  %vm1902_vm10 = vcmp.gt.s32.totalorder %v3280_v14, 5 }
  0x44   :  { %v2158_v24 = vsel %vm2157_vm5, 1, %v3119_v1  ;;  %v2454_v25 = vld [vmem:[%s3703_s9] ss:$0 sm:$0xff]  ;;  %vm2412_vm11 = vcmp.gt.s32.totalorder %v3280_v14, 7  ;;  %vm2430_vm3 = vcmask 254976   ;;  %vm2442_vm4 = vcmask 1024  }
  0x45   :  { %v133_v4 = vld [vmem:[%s3713_s18] sm:$0xff]  ;;  %v134_v5 = vld [vmem:[%s3713_s18 + $0x8] sm:$0xff] }
  0x46   :  { %2633 = vmatprep.mubr.msk.f32.mxu0 %vm143_vm0, %v133_v4  ;;  %2638 = vmatprep.mubr.msk.f32.mxu1 %vm143_vm0, %v133_v4  ;;  %v2451_v26 = vld [vmem:[%s3702_s8] ss:$0 sm:$0xff] }
  0x47   :  { %2634 = vmatmul.mubr.msk.f32.vlgmr.msra.gmra.mxu0 %vm143_vm0, %v134_v5  ;;  %2639 = vmatmul.mubr.msk.f32.vlgmr.msra.gmra.mxu1 %vm143_vm0, %v134_v5  ;;  %v2457_v32 = vld [vmem:[%s3704_s10] ss:$0 sm:$0xff] }
  0x48   :  { %2647 = vmatpush3.msra.mxu1 %v3244_v7  ;;  %2642 = vmatpush3.msra.mxu0 %v308_v6  ;;  %v3367_v36 = vld [vmem:[%s3705_s11] ss:$0 sm:$0xff] }
  0x49   :  { %2648 = vmatprep.subr.mxu1 %v3120_v8  ;;  %2643 = vmatprep.mubr.msk.f32.mxu0 %vm143_vm0, %v133_v4  ;;  %v3375_v42 = vld [vmem:[%s3706_s12] ss:$0 sm:$0xff] }
  0x4a   :  { %2649 = vmatpush3.msra.mxu1 %v3252_v9  ;;  %2657 = vmatprep.subr.mxu0 %v3120_v8  ;;  %v3385_v56 = vld [vmem:[%s3707_s13] ss:$0 sm:$0xff] }
  0x4b   :  { %2644 = vmatmul.mubr.msk.f32.vlgmr.msra.gmra.mxu0 %vm143_vm0, %v134_v5  ;;  %2650 = vmatprep.subr.mxu1 %v3120_v8 }
  0x4c   :  { %2658 = vmatpush3.msra.mxu0 %v3257_v10  ;;  %2651 = vmatpush3.msra.mxu1 %v3262_v11 }
  0x4d   :  { %2659 = vmatprep.subr.mxu0 %v3120_v8  ;;  %2652 = vmatprep.subr.mxu1 %v3120_v8 }
  0x4e   :  { %2660 = vmatpush3.msra.mxu0 %v3268_v12  ;;  %2653 = vmatpush3.msra.mxu1 %v3273_v13 }
  0x4f   :  { %2654 = vmatprep.mubr.msk.f32.mxu1 %vm3121_vm1, %v3120_v8  ;;  %2661 = vmatprep.subr.mxu0 %v3120_v8 }
  0x50   :  { %2655 = vmatmul.mubr.f32.vlgmr.msra.gmra.mxu1 %v3120_v8  ;;  %2662 = vmatpush3.msra.mxu0 %v3284_v15 }
  0x51   :  { %2663 = vmatprep.subr.mxu0 %v3120_v8  ;;  %2665 = vmatprep.mubr.msk.f32.mxu0 %vm3121_vm1, %v3120_v8 }
  0x52   :  { %2664 = vmatpush3.msra.mxu0 %v3291_v16  ;;  %2668 = vmatprep.subr.mxu1 %v3120_v8 }
  0x53   :  { %2666 = vmatmul.mubr.f32.vlgmr.msra.gmra.mxu0 %v3120_v8  ;;  %2669 = vmatpush3.msra.mxu1 %v3296_v17 }
  0x54   :  { %2670 = vmatprep.subr.mxu1 %v3120_v8  ;;  %2676 = vmatprep.mubr.msk.f32.mxu1 %vm3121_vm1, %v3120_v8 }
  0x55   :  { %2671 = vmatpush3.msra.mxu1 %v3303_v18  ;;  %2679 = vmatprep.subr.mxu0 %v3120_v8 }
  0x56   :  { %2672 = vmatprep.subr.mxu1 %v3120_v8  ;;  %2680 = vmatpush3.msra.mxu0 %v3244_v7 }
  0x57   :  { %2673 = vmatpush3.msra.mxu1 %v3310_v20  ;;  %2681 = vmatprep.subr.mxu0 %v3120_v8 }
  0x58   :  { %2674 = vmatprep.subr.mxu1 %v3120_v8  ;;  %899 = vperm.xlu0 %2920, %v897_v22   ;;  %v1152_v22 = vsel %vm1151_vm8, 1, %v3119_v1 }
  0x59   :  { %2675 = vmatpush3.msra.mxu1 %v3316_v21  ;;  %2682 = vmatpush3.msra.mxu0 %v3252_v9 }
  0x5a   :  { %2677 = vmatmul.mubr.f32.vlgmr.msra.gmra.mxu1 %v3120_v8  ;;  %2690 = vmatprep.subr.mxu1 %v3120_v8 }
  0x5b   :  { %2691 = vmatpush3.msra.mxu1 %v3257_v10  ;;  %2683 = vmatprep.subr.mxu0 %v3120_v8 }
  0x5c   :  { %2692 = vmatprep.subr.mxu1 %v3120_v8  ;;  %1653 = vperm.xlu0 %2920, %v1651_v23   ;;  %v1407_v23 = vsel %vm1406_vm9, 1, %v3119_v1 }
  0x5d   :  { %2693 = vmatpush3.msra.mxu1 %v3268_v12  ;;  %2684 = vmatpush3.msra.mxu0 %v3262_v11 }
  0x5e   :  { %2694 = vmatprep.subr.mxu1 %v3120_v8  ;;  %2685 = vmatprep.subr.mxu0 %v3120_v8 }
  0x5f   :  { %2695 = vmatpush3.msra.mxu1 %v3284_v15  ;;  %2686 = vmatpush3.msra.mxu0 %v3273_v13 }
  0x60   :  { %2696 = vmatprep.subr.mxu1 %v3120_v8  ;;  %2160 = vperm.xlu0 %2920, %v2158_v24   ;;  %v1903_v24 = vsel %vm1902_vm10, 1, %v3119_v1 }
  0x61   :  { %2687 = vmatprep.mubr.msk.f32.mxu0 %vm3121_vm1, %v3120_v8  ;;  %2697 = vmatpush3.msra.mxu1 %v3291_v16 }
  0x62   :  { %2698 = vmatprep.mubr.msk.f32.mxu1 %vm3121_vm1, %v3120_v8  ;;  %2701 = vmatprep.subr.mxu0 %v3120_v8 }
  0x63   :  { %2712 = vmatprep.subr.mxu1 %v3120_v8  ;;  %1154 = vperm.xlu1 %2921, %v1152_v22  }
  0x67   :  { %1409 = vperm.xlu1 %2921, %v1407_v23  }
  0x6b   :  { %1905 = vperm.xlu1 %2921, %v1903_v24  }
  0xbe   :  { %v648_v5 = vpop.permute.xlu0 %647 }
  0xbf   :  { %vm649_vm6 = vcmp.eq.s32.totalorder %v648_v5, 1 }
 0x107   :  { %v2640_v27 = vpop.f32.mrf.mxu1  ;;  %v2635_v28 = vpop.f32.mrf.mxu0 }
 0x108   :  { %v3355_v29 = vadd.f32 %v2640_v27, %v2454_v25  ;;  %v3357_v30 = vadd.f32 %v2635_v28, %v2451_v26 }
 0x109   :  { %v216_v31 = vpop.f32.mrf.mxu0  ;;  %v299_v35 = vpop.f32.mrf.mxu1 }
 0x10a   :  { %v3369_v39 = vadd.f32 %v2451_v26, %v216_v31  ;;  %v3379_v48 = vadd.f32 %v2454_v25, %v299_v35  ;;  %v2413_v25 = vsel %vm2412_vm11, 1, %v3119_v1 }
 0x10b   :  { %v2645_v33 = vpop.f32.mrf.mxu0  ;;  %2415 = vperm.xlu1 %2921, %v2413_v25  }
 0x10c   :  { %v3362_v34 = vadd.f32 %v2645_v33, %v2457_v32 }
 0x10d   :  { %v382_v37 = vpop.f32.mrf.mxu0 }
 0x10e   :  { %v3388_v60 = vadd.f32 %v2457_v32, %v382_v37 }
 0x110   :  { %v467_v38 = vpop.f32.mrf.mxu1 }
 0x111   :  { %v468_v40 = vadd.f32 %v3367_v36, %v467_v38 }
 0x112   :  { %v2656_v41 = vpop.f32.mrf.mxu1 }
 0x113   :  { %v623_v43 = vadd.f32 %v468_v40, %v3369_v39  ;;  %v543_v44 = vpop.f32.mrf.mxu0 }
 0x114   :  { %v544_v46 = vadd.f32 %v3375_v42, %v543_v44 }
 0x115   :  { %v2463_v45 = vmul.f32 -1.442695, %v623_v43  ;;  %v2667_v47 = vpop.f32.mrf.mxu0 }
 0x116   :  { %v630_v49 = vadd.f32 %v544_v46, %v3379_v48 }
 0x117   :  { %2922 = vpow2.f32 %v2463_v45 }
 0x118   :  { %v2464_v52 = vmul.f32 -1.442695, %v630_v49 }
 0x11a   :  { %v619_v50 = vpop.f32.mrf.mxu1  ;;  %2924 = vpow2.f32 %v2464_v52 }
 0x11b   :  { %v620_v58 = vadd.f32 %v3385_v56, %v619_v50 }
 0x11c   :  { %v2678_v51 = vpop.f32.mrf.mxu1 }
 0x124   :  { %v2923_v53 = vpop.eup %2922 }
 0x125   :  { %v627_v54 = vadd.f32 1.0, %v2923_v53 }
 0x127   :  { %2926 = vrcp.f32 %v627_v54  ;;  %v2925_v55 = vpop.eup %2924 }
 0x128   :  { %v634_v57 = vadd.f32 1.0, %v2925_v55 }
 0x12a   :  { %2928 = vrcp.f32 %v634_v57 }
 0x134   :  { %v2927_v59 = vpop.eup %2926 }
 0x135   :  { %v637_v61 = vmul.f32 %v2927_v59, %v620_v58 }
 0x137   :  { %v638_v62 = vadd.f32 %v637_v61, %v3388_v60  ;;  %v2929_v63 = vpop.eup %2928 }
 0x138   :  { %v640_v0 = vsub.f32 1.0, %v2929_v63  ;;  %v642_v4 = vmul.f32 0.0, %v2929_v63  ;;  %v900_v63 = vpop.permute.xlu0 %899 }
 0x139   :  { %2930 = vtanh.f32 %v638_v62  ;;  %vm901_vm12 = vcmp.eq.s32.totalorder %v900_v63, 1 }
 0x146   :  { %v2931_v2 = vpop.eup %2930 }
 0x147   :  { %v641_v3 = vmul.f32 %v2931_v2, %v640_v0 }
 0x149   :  { %v643_v6 = vadd.f32 %v642_v4, %v641_v3 }
 0x14b   :  { %v3391_v19 = vsel %vm649_vm6, %v643_v6, 0.0 }
 0x14c   :  { %2688 = vmatmul.mubr.msk.f32.vlgmr.msra.gmra.mxu0 %vm397_vm7, %v3391_v19  ;;  %2699 = vmatmul.mubr.msk.f32.vlgmr.msra.gmra.mxu1 %vm397_vm7, %v3391_v19  ;;  %v892_v55 = vrot.slane %v3391_v19, 6 }
 0x14d   :  { %2702 = vmatpush3.msra.mxu0 %v3296_v17  ;;  %2709 = vmatprep.mubr.msk.f32.mxu0 %vm3121_vm1, %v3120_v8 }
 0x14e   :  { %2703 = vmatprep.subr.mxu0 %v3120_v8  ;;  %2713 = vmatpush3.msra.mxu1 %v3244_v7 }
 0x14f   :  { %2704 = vmatpush3.msra.mxu0 %v3303_v18  ;;  %2714 = vmatprep.subr.mxu1 %v3120_v8 }
 0x150   :  { %2705 = vmatprep.subr.mxu0 %v3120_v8  ;;  %2715 = vmatpush3.msra.mxu1 %v3252_v9 }
 0x151   :  { %2706 = vmatpush3.msra.mxu0 %v3310_v20  ;;  %2716 = vmatprep.subr.mxu1 %v3120_v8 }
 0x152   :  { %2707 = vmatprep.subr.mxu0 %v3120_v8  ;;  %2717 = vmatpush3.msra.mxu1 %v3262_v11 }
 0x153   :  { %2708 = vmatpush3.msra.mxu0 %v3316_v21  ;;  %2718 = vmatprep.subr.mxu1 %v3120_v8 }
 0x154   :  { %2710 = vmatmul.mubr.msk.f32.vlgmr.msra.gmra.mxu0 %vm397_vm7, %v3391_v19  ;;  %2723 = vmatprep.subr.mxu0 %v3120_v8 }
 0x155   :  { %2724 = vmatpush3.msra.mxu0 %v3257_v10  ;;  %2719 = vmatpush3.msra.mxu1 %v3273_v13 }
 0x156   :  { %2725 = vmatprep.subr.mxu0 %v3120_v8  ;;  %2720 = vmatprep.mubr.msk.f32.mxu1 %vm3121_vm1, %v3120_v8 }
 0x157   :  { %2726 = vmatpush3.msra.mxu0 %v3268_v12  ;;  %2731 = vmatprep.mubr.msk.f32.mxu0 %vm3121_vm1, %v3120_v8 }
 0x158   :  { %2727 = vmatprep.subr.mxu0 %v3120_v8  ;;  %2734 = vmatprep.subr.mxu1 %v3120_v8 }
 0x159   :  { %2728 = vmatpush3.msra.mxu0 %v3284_v15 }
 0x15a   :  { %2729 = vmatprep.subr.mxu0 %v3120_v8 }
 0x15b   :  { %2730 = vmatpush3.msra.mxu0 %v3291_v16 }
 0x15c   :  { %2745 = vmatprep.subr.mxu0 %v3120_v8 }
 0x20c   :  { %v720_v26 = vpop.f32.mrf.mxu0  ;;  %v790_v27 = vpop.f32.mrf.mxu1 }
 0x20d   :  { %v721_v28 = vadd.f32 %v3367_v36, %v720_v26  ;;  %v791_v35 = vadd.f32 %v3375_v42, %v790_v27 }
 0x20e   :  { %v2689_v31 = vpop.f32.mrf.mxu0  ;;  %v2700_v32 = vpop.f32.mrf.mxu1 }
 0x20f   :  { %v865_v33 = vrot.slane %v721_v28, 6  ;;  %v875_v40 = vrot.slane %v791_v35, 6 }
 0x211   :  { %v867_v37 = vadd.f32 %v865_v33, %v3369_v39  ;;  %v877_v43 = vadd.f32 %v875_v40, %v3379_v48 }
 0x213   :  { %v2468_v38 = vmul.f32 -1.442695, %v867_v37  ;;  %v2469_v1 = vmul.f32 -1.442695, %v877_v43 }
 0x214   :  { %v860_v41 = vpop.f32.mrf.mxu0 }
 0x215   :  { %2932 = vpow2.f32 %v2468_v38  ;;  %v861_v47 = vadd.f32 %v3385_v56, %v860_v41 }
 0x216   :  { %v2711_v14 = vpop.f32.mrf.mxu0  ;;  %2934 = vpow2.f32 %v2469_v1 }
 0x217   :  { %v885_v50 = vrot.slane %v861_v47, 6 }
 0x222   :  { %v2933_v44 = vpop.eup %2932 }
 0x223   :  { %v871_v45 = vadd.f32 1.0, %v2933_v44  ;;  %v2935_v46 = vpop.eup %2934 }
 0x224   :  { %v881_v49 = vadd.f32 1.0, %v2935_v46 }
 0x225   :  { %2936 = vrcp.f32 %v871_v45 }
 0x226   :  { %2938 = vrcp.f32 %v881_v49 }
 0x232   :  { %v2937_v51 = vpop.eup %2936 }
 0x233   :  { %v887_v52 = vmul.f32 %v2937_v51, %v885_v50  ;;  %v2939_v54 = vpop.eup %2938  ;;  %v1155_v51 = vpop.permute.xlu1 %1154 }
 0x234   :  { %v890_v57 = vsub.f32 1.0, %v2939_v54  ;;  %v894_v61 = vmul.f32 %v2939_v54, %v892_v55  ;;  %vm1156_vm13 = vcmp.eq.s32.totalorder %v1155_v51, 1 }
 0x235   :  { %v888_v53 = vadd.f32 %v887_v52, %v3388_v60 }
 0x237   :  { %2940 = vtanh.f32 %v888_v53 }
 0x244   :  { %v2941_v58 = vpop.eup %2940 }
 0x245   :  { %v891_v59 = vmul.f32 %v2941_v58, %v890_v57 }
 0x247   :  { %v895_v62 = vadd.f32 %v894_v61, %v891_v59 }
 0x249   :  { %v903_v0 = vrot.slane %v895_v62, 2 }
 0x24b   :  { %v3445_v2 = vsel %vm901_vm12, %v903_v0, %v3391_v19 }
 0x24c   :  { %2721 = vmatmul.mubr.msk.f32.vlgmr.msra.gmra.mxu1 %vm397_vm7, %v3445_v2  ;;  %2732 = vmatmul.mubr.msk.f32.vlgmr.msra.gmra.mxu0 %vm397_vm7, %v3445_v2  ;;  %v1147_v46 = vrot.slane %v3445_v2, 4 }
 0x24d   :  { %2735 = vmatpush3.msra.mxu1 %v3296_v17  ;;  %2742 = vmatprep.mubr.msk.f32.mxu1 %vm3121_vm1, %v3120_v8 }
 0x24e   :  { %2736 = vmatprep.subr.mxu1 %v3120_v8  ;;  %2746 = vmatpush3.msra.mxu0 %v3244_v7 }
 0x24f   :  { %2737 = vmatpush3.msra.mxu1 %v3303_v18  ;;  %2747 = vmatprep.subr.mxu0 %v3120_v8 }
 0x250   :  { %2738 = vmatprep.subr.mxu1 %v3120_v8  ;;  %2748 = vmatpush3.msra.mxu0 %v3252_v9 }
 0x251   :  { %2739 = vmatpush3.msra.mxu1 %v3310_v20  ;;  %2749 = vmatprep.subr.mxu0 %v3120_v8 }
 0x252   :  { %2740 = vmatprep.subr.mxu1 %v3120_v8  ;;  %2750 = vmatpush3.msra.mxu0 %v3262_v11 }
 0x253   :  { %2741 = vmatpush3.msra.mxu1 %v3316_v21  ;;  %2751 = vmatprep.subr.mxu0 %v3120_v8 }
 0x254   :  { %2743 = vmatmul.mubr.msk.f32.vlgmr.msra.gmra.mxu1 %vm397_vm7, %v3445_v2  ;;  %2756 = vmatprep.subr.mxu1 %v3120_v8 }
 0x255   :  { %2757 = vmatpush3.msra.mxu1 %v3257_v10  ;;  %2752 = vmatpush3.msra.mxu0 %v3273_v13 }
 0x256   :  { %2758 = vmatprep.subr.mxu1 %v3120_v8  ;;  %2753 = vmatprep.mubr.msk.f32.mxu0 %vm3121_vm1, %v3120_v8 }
 0x257   :  { %2759 = vmatpush3.msra.mxu1 %v3268_v12  ;;  %2764 = vmatprep.mubr.msk.f32.mxu1 %vm3121_vm1, %v3120_v8 }
 0x258   :  { %2760 = vmatprep.subr.mxu1 %v3120_v8  ;;  %2767 = vmatprep.subr.mxu0 %v3120_v8 }
 0x259   :  { %2761 = vmatpush3.msra.mxu1 %v3284_v15 }
 0x25a   :  { %2762 = vmatprep.subr.mxu1 %v3120_v8 }
 0x25b   :  { %2763 = vmatpush3.msra.mxu1 %v3291_v16 }
 0x25c   :  { %2778 = vmatprep.subr.mxu1 %v3120_v8 }
 0x30c   :  { %v975_v3 = vpop.f32.mrf.mxu1  ;;  %v1045_v4 = vpop.f32.mrf.mxu0 }
 0x30d   :  { %v976_v5 = vadd.f32 %v3367_v36, %v975_v3  ;;  %v1046_v23 = vadd.f32 %v3375_v42, %v1045_v4 }
 0x30e   :  { %v2722_v6 = vpop.f32.mrf.mxu1  ;;  %v2733_v19 = vpop.f32.mrf.mxu0 }
 0x30f   :  { %v1120_v22 = vrot.slane %v976_v5, 4  ;;  %v1130_v26 = vrot.slane %v1046_v23, 4 }
 0x311   :  { %v1122_v24 = vadd.f32 %v1120_v22, %v3369_v39  ;;  %v1132_v31 = vadd.f32 %v1130_v26, %v3379_v48 }
 0x313   :  { %v2473_v25 = vmul.f32 -1.442695, %v1122_v24  ;;  %v2474_v32 = vmul.f32 -1.442695, %v1132_v31 }
 0x314   :  { %v1115_v27 = vpop.f32.mrf.mxu1 }
 0x315   :  { %2942 = vpow2.f32 %v2473_v25  ;;  %v1116_v38 = vadd.f32 %v3385_v56, %v1115_v27 }
 0x316   :  { %v2744_v28 = vpop.f32.mrf.mxu1  ;;  %2944 = vpow2.f32 %v2474_v32 }
 0x317   :  { %v1140_v41 = vrot.slane %v1116_v38, 4 }
 0x322   :  { %v2943_v33 = vpop.eup %2942 }
 0x323   :  { %v1126_v35 = vadd.f32 1.0, %v2943_v33  ;;  %v2945_v37 = vpop.eup %2944 }
 0x324   :  { %v1136_v40 = vadd.f32 1.0, %v2945_v37 }
 0x325   :  { %2946 = vrcp.f32 %v1126_v35 }
 0x326   :  { %2948 = vrcp.f32 %v1136_v40 }
 0x332   :  { %v2947_v14 = vpop.eup %2946 }
 0x333   :  { %v1142_v43 = vmul.f32 %v2947_v14, %v1140_v41  ;;  %v2949_v44 = vpop.eup %2948  ;;  %v1410_v41 = vpop.permute.xlu1 %1409 }
 0x334   :  { %v1145_v45 = vsub.f32 1.0, %v2949_v44  ;;  %v1149_v50 = vmul.f32 %v2949_v44, %v1147_v46  ;;  %vm1411_vm14 = vcmp.eq.s32.totalorder %v1410_v41, 1 }
 0x335   :  { %v1143_v1 = vadd.f32 %v1142_v43, %v3388_v60 }
 0x337   :  { %2950 = vtanh.f32 %v1143_v1 }
 0x344   :  { %v2951_v47 = vpop.eup %2950 }
 0x345   :  { %v1146_v49 = vmul.f32 %v2951_v47, %v1145_v45 }
 0x347   :  { %v1150_v52 = vadd.f32 %v1149_v50, %v1146_v49 }
 0x349   :  { %v1158_v53 = vrot.slane %v1150_v52, 4 }
 0x34b   :  { %v3491_v54 = vsel %vm1156_vm13, %v1158_v53, %v3445_v2 }
 0x34c   :  { %2754 = vmatmul.mubr.msk.f32.vlgmr.msra.gmra.mxu0 %vm397_vm7, %v3491_v54  ;;  %2765 = vmatmul.mubr.msk.f32.vlgmr.msra.gmra.mxu1 %vm397_vm7, %v3491_v54  ;;  %v1402_v33 = vrot.slane %v3491_v54, 2 }
 0x34d   :  { %2768 = vmatpush3.msra.mxu0 %v3296_v17  ;;  %2775 = vmatprep.mubr.msk.f32.mxu0 %vm3121_vm1, %v3120_v8 }
 0x34e   :  { %2769 = vmatprep.subr.mxu0 %v3120_v8  ;;  %2779 = vmatpush3.msra.mxu1 %v3244_v7 }
 0x34f   :  { %2770 = vmatpush3.msra.mxu0 %v3303_v18  ;;  %2780 = vmatprep.subr.mxu1 %v3120_v8 }
 0x350   :  { %2771 = vmatprep.subr.mxu0 %v3120_v8  ;;  %2781 = vmatpush3.msra.mxu1 %v3252_v9 }
 0x351   :  { %2772 = vmatpush3.msra.mxu0 %v3310_v20  ;;  %2782 = vmatprep.subr.mxu1 %v3120_v8 }
 0x352   :  { %2773 = vmatprep.subr.mxu0 %v3120_v8  ;;  %2783 = vmatpush3.msra.mxu1 %v3262_v11 }
 0x353   :  { %2774 = vmatpush3.msra.mxu0 %v3316_v21  ;;  %2784 = vmatprep.subr.mxu1 %v3120_v8 }
 0x354   :  { %2776 = vmatmul.mubr.msk.f32.vlgmr.msra.gmra.mxu0 %vm397_vm7, %v3491_v54  ;;  %2789 = vmatprep.subr.mxu0 %v3120_v8 }
 0x355   :  { %2790 = vmatpush3.msra.mxu0 %v3257_v10  ;;  %2785 = vmatpush3.msra.mxu1 %v3273_v13 }
 0x356   :  { %2791 = vmatprep.subr.mxu0 %v3120_v8  ;;  %2786 = vmatprep.mubr.msk.f32.mxu1 %vm3121_vm1, %v3120_v8 }
 0x357   :  { %2792 = vmatpush3.msra.mxu0 %v3268_v12  ;;  %2797 = vmatprep.mubr.msk.f32.mxu0 %vm3121_vm1, %v3120_v8 }
 0x358   :  { %2793 = vmatprep.subr.mxu0 %v3120_v8  ;;  %2800 = vmatprep.subr.mxu1 %v3120_v8 }
 0x359   :  { %2794 = vmatpush3.msra.mxu0 %v3284_v15 }
 0x35a   :  { %2795 = vmatprep.subr.mxu0 %v3120_v8 }
 0x35b   :  { %2796 = vmatpush3.msra.mxu0 %v3291_v16 }
 0x35c   :  { %2811 = vmatprep.subr.mxu0 %v3120_v8 }
 0x40c   :  { %v1230_v55 = vpop.f32.mrf.mxu0  ;;  %v1300_v57 = vpop.f32.mrf.mxu1 }
 0x40d   :  { %v1231_v58 = vadd.f32 %v3367_v36, %v1230_v55  ;;  %v1301_v63 = vadd.f32 %v3375_v42, %v1300_v57 }
 0x40e   :  { %v2755_v59 = vpop.f32.mrf.mxu0  ;;  %v2766_v61 = vpop.f32.mrf.mxu1 }
 0x40f   :  { %v1375_v62 = vrot.slane %v1231_v58, 2  ;;  %v1385_v3 = vrot.slane %v1301_v63, 2 }
 0x411   :  { %v1377_v0 = vadd.f32 %v1375_v62, %v3369_v39  ;;  %v1387_v6 = vadd.f32 %v1385_v3, %v3379_v48 }
 0x413   :  { %v2478_v2 = vmul.f32 -1.442695, %v1377_v0  ;;  %v2479_v19 = vmul.f32 -1.442695, %v1387_v6 }
 0x414   :  { %v1370_v4 = vpop.f32.mrf.mxu0 }
 0x415   :  { %2952 = vpow2.f32 %v2478_v2  ;;  %v1371_v25 = vadd.f32 %v3385_v56, %v1370_v4 }
 0x416   :  { %v2777_v5 = vpop.f32.mrf.mxu0  ;;  %2954 = vpow2.f32 %v2479_v19  ;;  %v1654_v19 = vpop.permute.xlu0 %1653 }
 0x417   :  { %v1395_v27 = vrot.slane %v1371_v25, 2  ;;  %vm1655_vm15 = vcmp.eq.s32.totalorder %v1654_v19, 1 }
 0x422   :  { %v2953_v22 = vpop.eup %2952 }
 0x423   :  { %v1381_v23 = vadd.f32 1.0, %v2953_v22  ;;  %v2955_v24 = vpop.eup %2954 }
 0x424   :  { %v1391_v26 = vadd.f32 1.0, %v2955_v24 }
 0x425   :  { %2956 = vrcp.f32 %v1381_v23 }
 0x426   :  { %2958 = vrcp.f32 %v1391_v26 }
 0x432   :  { %v2957_v28 = vpop.eup %2956 }
 0x433   :  { %v1397_v39 = vmul.f32 %v2957_v28, %v1395_v27  ;;  %v2959_v32 = vpop.eup %2958 }
 0x434   :  { %v1400_v48 = vsub.f32 1.0, %v2959_v32  ;;  %v1404_v38 = vmul.f32 %v2959_v32, %v1402_v33 }
 0x435   :  { %v1398_v31 = vadd.f32 %v1397_v39, %v3388_v60 }
 0x437   :  { %2960 = vtanh.f32 %v1398_v31 }
 0x444   :  { %v2961_v35 = vpop.eup %2960 }
 0x445   :  { %v1401_v37 = vmul.f32 %v2961_v35, %v1400_v48 }
 0x447   :  { %v1405_v40 = vadd.f32 %v1404_v38, %v1401_v37 }
 0x449   :  { %v1413_v14 = vrot.slane %v1405_v40, 6 }
 0x44b   :  { %v3537_v43 = vsel %vm1411_vm14, %v1413_v14, %v3491_v54 }
 0x44c   :  { %2787 = vmatmul.mubr.msk.f32.vlgmr.msra.gmra.mxu1 %vm397_vm7, %v3537_v43  ;;  %2798 = vmatmul.mubr.msk.f32.vlgmr.msra.gmra.mxu0 %vm397_vm7, %v3537_v43 }
 0x44d   :  { %2801 = vmatpush3.msra.mxu1 %v3296_v17  ;;  %2808 = vmatprep.mubr.msk.f32.mxu1 %vm3121_vm1, %v3120_v8 }
 0x44e   :  { %2802 = vmatprep.subr.mxu1 %v3120_v8  ;;  %2812 = vmatpush3.msra.mxu0 %v3244_v7 }
 0x44f   :  { %2803 = vmatpush3.msra.mxu1 %v3303_v18  ;;  %2813 = vmatprep.subr.mxu0 %v3120_v8 }
 0x450   :  { %2804 = vmatprep.subr.mxu1 %v3120_v8  ;;  %2814 = vmatpush3.msra.mxu0 %v3252_v9 }
 0x451   :  { %2805 = vmatpush3.msra.mxu1 %v3310_v20  ;;  %2815 = vmatprep.subr.mxu0 %v3120_v8 }
 0x452   :  { %2806 = vmatprep.subr.mxu1 %v3120_v8  ;;  %2816 = vmatpush3.msra.mxu0 %v3262_v11 }
 0x453   :  { %2807 = vmatpush3.msra.mxu1 %v3316_v21  ;;  %2817 = vmatprep.subr.mxu0 %v3120_v8 }
 0x454   :  { %2809 = vmatmul.mubr.msk.f32.vlgmr.msra.gmra.mxu1 %vm397_vm7, %v3537_v43  ;;  %2822 = vmatprep.subr.mxu1 %v3120_v8 }
 0x455   :  { %2823 = vmatpush3.msra.mxu1 %v3257_v10  ;;  %2818 = vmatpush3.msra.mxu0 %v3273_v13 }
 0x456   :  { %2824 = vmatprep.subr.mxu1 %v3120_v8  ;;  %2819 = vmatprep.mubr.msk.f32.mxu0 %vm3121_vm1, %v3120_v8 }
 0x457   :  { %2825 = vmatpush3.msra.mxu1 %v3268_v12  ;;  %2830 = vmatprep.mubr.msk.f32.mxu1 %vm3121_vm1, %v3120_v8 }
 0x458   :  { %2826 = vmatprep.subr.mxu1 %v3120_v8  ;;  %2833 = vmatprep.subr.mxu0 %v3120_v8 }
 0x459   :  { %2827 = vmatpush3.msra.mxu1 %v3284_v15 }
 0x45a   :  { %2828 = vmatprep.subr.mxu1 %v3120_v8 }
 0x45b   :  { %2829 = vmatpush3.msra.mxu1 %v3291_v16 }
 0x45c   :  { %2844 = vmatprep.subr.mxu1 %v3120_v8 }
 0x50c   :  { %v1485_v60 = vpop.f32.mrf.mxu1  ;;  %v1555_v1 = vpop.f32.mrf.mxu0 }
 0x50d   :  { %v1486_v44 = vadd.f32 %v3367_v36, %v1485_v60  ;;  %v1556_v50 = vadd.f32 %v3375_v42, %v1555_v1 }
 0x50e   :  { %v2788_v45 = vpop.f32.mrf.mxu1  ;;  %v2799_v46 = vpop.f32.mrf.mxu0 }
 0x50f   :  { %v1629_v47 = vadd.f32 %v1486_v44, %v3357_v30  ;;  %v1636_v52 = vadd.f32 %v1556_v50, %v3355_v29 }
 0x511   :  { %v2483_v49 = vmul.f32 -1.442695, %v1629_v47  ;;  %v2484_v54 = vmul.f32 -1.442695, %v1636_v52 }
 0x513   :  { %2962 = vpow2.f32 %v2483_v49 }
 0x514   :  { %v1625_v51 = vpop.f32.mrf.mxu1  ;;  %2964 = vpow2.f32 %v2484_v54 }
 0x515   :  { %v1626_v61 = vadd.f32 %v3385_v56, %v1625_v51 }
 0x516   :  { %v2810_v53 = vpop.f32.mrf.mxu1 }
 0x520   :  { %v2963_v55 = vpop.eup %2962 }
 0x521   :  { %v1633_v57 = vadd.f32 1.0, %v2963_v55  ;;  %v2965_v58 = vpop.eup %2964 }
 0x522   :  { %v1640_v59 = vadd.f32 1.0, %v2965_v58 }
 0x523   :  { %2966 = vrcp.f32 %v1633_v57  ;;  %v1906_v57 = vpop.permute.xlu1 %1905 }
 0x524   :  { %2968 = vrcp.f32 %v1640_v59  ;;  %vm1907_vm0 = vcmp.eq.s32.totalorder %v1906_v57, 1 }
 0x530   :  { %v2967_v62 = vpop.eup %2966 }
 0x531   :  { %v1643_v63 = vmul.f32 %v2967_v62, %v1626_v61  ;;  %v2969_v2 = vpop.eup %2968 }
 0x532   :  { %v1646_v3 = vsub.f32 1.0, %v2969_v2  ;;  %v1648_v6 = vmul.f32 %v2969_v2, %v3537_v43 }
 0x533   :  { %v1644_v0 = vadd.f32 %v1643_v63, %v3362_v34 }
 0x535   :  { %2970 = vtanh.f32 %v1644_v0 }
 0x542   :  { %v2971_v4 = vpop.eup %2970 }
 0x543   :  { %v1647_v5 = vmul.f32 %v2971_v4, %v1646_v3 }
 0x545   :  { %v1649_v22 = vadd.f32 %v1648_v6, %v1647_v5 }
 0x547   :  { %v3583_v23 = vsel %vm1655_vm15, %v1649_v22, %v3537_v43 }
 0x548   :  { %2820 = vmatmul.mubr.msk.f32.vlgmr.msra.gmra.mxu0 %vm397_vm7, %v3583_v23  ;;  %2831 = vmatmul.mubr.msk.f32.vlgmr.msra.gmra.mxu1 %vm397_vm7, %v3583_v23  ;;  %v1898_v50 = vrot.slane %v3583_v23, 6 }
 0x549   :  { %2834 = vmatpush3.msra.mxu0 %v3296_v17  ;;  %2841 = vmatprep.mubr.msk.f32.mxu0 %vm3121_vm1, %v3120_v8 }
 0x54a   :  { %2835 = vmatprep.subr.mxu0 %v3120_v8  ;;  %2845 = vmatpush3.msra.mxu1 %v3244_v7 }
 0x54b   :  { %2836 = vmatpush3.msra.mxu0 %v3303_v18  ;;  %2846 = vmatprep.subr.mxu1 %v3120_v8 }
 0x54c   :  { %2837 = vmatprep.subr.mxu0 %v3120_v8  ;;  %2847 = vmatpush3.msra.mxu1 %v3252_v9 }
 0x54d   :  { %2838 = vmatpush3.msra.mxu0 %v3310_v20  ;;  %2848 = vmatprep.subr.mxu1 %v3120_v8 }
 0x54e   :  { %2839 = vmatprep.subr.mxu0 %v3120_v8  ;;  %2849 = vmatpush3.msra.mxu1 %v3262_v11 }
 0x54f   :  { %2840 = vmatpush3.msra.mxu0 %v3316_v21  ;;  %2850 = vmatprep.subr.mxu1 %v3120_v8 }
 0x550   :  { %2842 = vmatmul.mubr.msk.f32.vlgmr.msra.gmra.mxu0 %vm397_vm7, %v3583_v23  ;;  %2855 = vmatprep.subr.mxu0 %v3120_v8 }
 0x551   :  { %2856 = vmatpush3.msra.mxu0 %v3257_v10  ;;  %2851 = vmatpush3.msra.mxu1 %v3273_v13 }
 0x552   :  { %2857 = vmatprep.subr.mxu0 %v3120_v8  ;;  %2852 = vmatprep.mubr.msk.f32.mxu1 %vm3121_vm1, %v3120_v8 }
 0x553   :  { %2858 = vmatpush3.msra.mxu0 %v3268_v12  ;;  %2863 = vmatprep.mubr.msk.f32.mxu0 %vm3121_vm1, %v3120_v8 }
 0x554   :  { %2859 = vmatprep.subr.mxu0 %v3120_v8  ;;  %2866 = vmatprep.subr.mxu1 %v3120_v8 }
 0x555   :  { %2860 = vmatpush3.msra.mxu0 %v3284_v15 }
 0x556   :  { %2861 = vmatprep.subr.mxu0 %v3120_v8 }
 0x557   :  { %2862 = vmatpush3.msra.mxu0 %v3291_v16 }
 0x558   :  { %2877 = vmatprep.subr.mxu0 %v3120_v8 }
 0x608   :  { %v1726_v24 = vpop.f32.mrf.mxu0  ;;  %v1796_v25 = vpop.f32.mrf.mxu1 }
 0x609   :  { %v1727_v26 = vadd.f32 %v3367_v36, %v1726_v24  ;;  %v1797_v31 = vadd.f32 %v3375_v42, %v1796_v25 }
 0x60a   :  { %v2821_v27 = vpop.f32.mrf.mxu0  ;;  %v2832_v28 = vpop.f32.mrf.mxu1 }
 0x60b   :  { %v1871_v39 = vrot.slane %v1727_v26, 6  ;;  %v1881_v48 = vrot.slane %v1797_v31, 6 }
 0x60d   :  { %v1873_v32 = vadd.f32 %v1871_v39, %v3357_v30  ;;  %v1883_v38 = vadd.f32 %v1881_v48, %v3355_v29  ;;  %v2161_v39 = vpop.permute.xlu0 %2160  ;;  %v3002_v48 = vld [vmem:[#allocation10 + $0x18] sm:$0xff] }
 0x60e   :  { %vm2162_vm2 = vcmp.eq.s32.totalorder %v2161_v39, 1 }
 0x60f   :  { %v2488_v33 = vmul.f32 -1.442695, %v1873_v32  ;;  %v2489_v40 = vmul.f32 -1.442695, %v1883_v38  ;;  %v3005_v38 = vld [vmem:[#allocation10] sm:$0xff] }
 0x610   :  { %v1866_v35 = vpop.f32.mrf.mxu0 }
 0x611   :  { %2972 = vpow2.f32 %v2488_v33  ;;  %v1867_v60 = vadd.f32 %v3385_v56, %v1866_v35  ;;  %v3003_v35 = vld [vmem:[#allocation10 + $0x10] sm:$0xff] }
 0x612   :  { %v2843_v37 = vpop.f32.mrf.mxu0  ;;  %2974 = vpow2.f32 %v2489_v40 }
 0x613   :  { %v1891_v44 = vrot.slane %v1867_v60, 6  ;;  %v3004_v37 = vld [vmem:[#allocation10 + $0x8] sm:$0xff] }
 0x61e   :  { %v2973_v41 = vpop.eup %2972 }
 0x61f   :  { %v1877_v14 = vadd.f32 1.0, %v2973_v41  ;;  %v2975_v43 = vpop.eup %2974 }
 0x620   :  { %v1887_v1 = vadd.f32 1.0, %v2975_v43 }
 0x621   :  { %2976 = vrcp.f32 %v1877_v14 }
 0x622   :  { %2978 = vrcp.f32 %v1887_v1 }
 0x62e   :  { %v2977_v45 = vpop.eup %2976 }
 0x62f   :  { %v1893_v46 = vmul.f32 %v2977_v45, %v1891_v44  ;;  %v2979_v49 = vpop.eup %2978 }
 0x630   :  { %v1896_v51 = vsub.f32 1.0, %v2979_v49  ;;  %v1900_v54 = vmul.f32 %v2979_v49, %v1898_v50 }
 0x631   :  { %v1894_v47 = vadd.f32 %v1893_v46, %v3362_v34 }
 0x633   :  { %2980 = vtanh.f32 %v1894_v47 }
 0x640   :  { %v2981_v52 = vpop.eup %2980 }
 0x641   :  { %v1897_v53 = vmul.f32 %v2981_v52, %v1896_v51 }
 0x643   :  { %v1901_v55 = vadd.f32 %v1900_v54, %v1897_v53 }
 0x645   :  { %v1909_v58 = vrot.slane %v1901_v55, 2 }
 0x647   :  { %v3629_v59 = vsel %vm1907_vm0, %v1909_v58, %v3583_v23 }
 0x648   :  { %2853 = vmatmul.mubr.msk.f32.vlgmr.msra.gmra.mxu1 %vm397_vm7, %v3629_v59  ;;  %2864 = vmatmul.mubr.msk.f32.vlgmr.msra.gmra.mxu0 %vm397_vm7, %v3629_v59  ;;  %v2153_v24 = vrot.slane %v3629_v59, 4 }
 0x649   :  { %2867 = vmatpush3.msra.mxu1 %v3296_v17  ;;  %2874 = vmatprep.mubr.msk.f32.mxu1 %vm3121_vm1, %v3120_v8 }
 0x64a   :  { %2868 = vmatprep.subr.mxu1 %v3120_v8  ;;  %2878 = vmatpush3.msra.mxu0 %v3244_v7 }
 0x64b   :  { %2869 = vmatpush3.msra.mxu1 %v3303_v18  ;;  %2879 = vmatprep.subr.mxu0 %v3120_v8 }
 0x64c   :  { %2870 = vmatprep.subr.mxu1 %v3120_v8  ;;  %2880 = vmatpush3.msra.mxu0 %v3252_v9 }
 0x64d   :  { %2871 = vmatpush3.msra.mxu1 %v3310_v20  ;;  %2881 = vmatprep.subr.mxu0 %v3120_v8 }
 0x64e   :  { %2872 = vmatprep.subr.mxu1 %v3120_v8  ;;  %2882 = vmatpush3.msra.mxu0 %v3262_v11 }
 0x64f   :  { %2873 = vmatpush3.msra.mxu1 %v3316_v21  ;;  %2883 = vmatprep.subr.mxu0 %v3120_v8 }
 0x650   :  { %2875 = vmatmul.mubr.msk.f32.vlgmr.msra.gmra.mxu1 %vm397_vm7, %v3629_v59  ;;  %2888 = vmatprep.subr.mxu1 %v3120_v8 }
 0x651   :  { %2889 = vmatpush3.msra.mxu1 %v3257_v10  ;;  %2884 = vmatpush3.msra.mxu0 %v3273_v13 }
 0x652   :  { %2890 = vmatprep.subr.mxu1 %v3120_v8  ;;  %2885 = vmatprep.mubr.msk.f32.mxu0 %vm3121_vm1, %v3120_v8 }
 0x653   :  { %2891 = vmatpush3.msra.mxu1 %v3268_v12  ;;  %2896 = vmatprep.mubr.msk.f32.mxu1 %vm3121_vm1, %v3120_v8 }
 0x654   :  { %2892 = vmatprep.subr.mxu1 %v3120_v8  ;;  %2899 = vmatprep.subr.mxu0 %v3120_v8 }
 0x655   :  { %2893 = vmatpush3.msra.mxu1 %v3284_v15 }
 0x656   :  { %2894 = vmatprep.subr.mxu1 %v3120_v8 }
 0x657   :  { %2895 = vmatpush3.msra.mxu1 %v3291_v16 }
 0x708   :  { %v1981_v7 = vpop.f32.mrf.mxu1  ;;  %v2051_v9 = vpop.f32.mrf.mxu0 }
 0x709   :  { %v1982_v10 = vadd.f32 %v3367_v36, %v1981_v7  ;;  %v2052_v17 = vadd.f32 %v3375_v42, %v2051_v9 }
 0x70a   :  { %v2854_v11 = vpop.f32.mrf.mxu1  ;;  %v2865_v13 = vpop.f32.mrf.mxu0 }
 0x70b   :  { %v2126_v12 = vrot.slane %v1982_v10, 4  ;;  %v2136_v21 = vrot.slane %v2052_v17, 4  ;;  %v2416_v13 = vpop.permute.xlu1 %2415 }
 0x70d   :  { %v2128_v18 = vadd.f32 %v2126_v12, %v3357_v30  ;;  %v2138_v62 = vadd.f32 %v2136_v21, %v3355_v29 }
 0x70f   :  { %v2493_v20 = vmul.f32 -1.442695, %v2128_v18  ;;  %v2494_v63 = vmul.f32 -1.442695, %v2138_v62 }
 0x710   :  { %v2121_v61 = vpop.f32.mrf.mxu1 }
 0x711   :  { %2982 = vpow2.f32 %v2493_v20  ;;  %v2122_v3 = vadd.f32 %v3385_v56, %v2121_v61 }
 0x712   :  { %v2876_v15 = vpop.f32.mrf.mxu1  ;;  %2984 = vpow2.f32 %v2494_v63 }
 0x713   :  { %v2146_v5 = vrot.slane %v2122_v3, 4 }
 0x71e   :  { %v2983_v16 = vpop.eup %2982 }
 0x71f   :  { %v2132_v0 = vadd.f32 1.0, %v2983_v16  ;;  %v2985_v2 = vpop.eup %2984 }
 0x720   :  { %v2142_v4 = vadd.f32 1.0, %v2985_v2 }
 0x721   :  { %2986 = vrcp.f32 %v2132_v0 }
 0x722   :  { %2988 = vrcp.f32 %v2142_v4 }
 0x72e   :  { %v2987_v6 = vpop.eup %2986 }
 0x72f   :  { %v2148_v19 = vmul.f32 %v2987_v6, %v2146_v5  ;;  %v2989_v23 = vpop.eup %2988 }
 0x730   :  { %v2151_v25 = vsub.f32 1.0, %v2989_v23  ;;  %v2155_v28 = vmul.f32 %v2989_v23, %v2153_v24 }
 0x731   :  { %v2149_v22 = vadd.f32 %v2148_v19, %v3362_v34 }
 0x733   :  { %2990 = vtanh.f32 %v2149_v22 }
 0x740   :  { %v2991_v26 = vpop.eup %2990 }
 0x741   :  { %v2152_v27 = vmul.f32 %v2991_v26, %v2151_v25 }
 0x743   :  { %v2156_v31 = vadd.f32 %v2155_v28, %v2152_v27 }
 0x745   :  { %v2164_v32 = vrot.slane %v2156_v31, 4 }
 0x747   :  { %v2166_v33 = vsel %vm2162_vm2, %v2164_v32, %v3629_v59 }
 0x748   :  { %2886 = vmatmul.mubr.msk.f32.vlgmr.msra.gmra.mxu0 %vm397_vm7, %v2166_v33  ;;  %2897 = vmatmul.mubr.msk.f32.vlgmr.msra.gmra.mxu1 %vm397_vm7, %v2166_v33  ;;  %v2408_v7 = vrot.slane %v2166_v33, 2 }
 0x749   :  { %2900 = vmatpush3.msra.mxu0 %v3002_v48  ;;  %2907 = vmatprep.mubr.msk.f32.mxu0 %vm3121_vm1, %v3120_v8  ;;  %vm2417_vm1 = vcmp.eq.s32.totalorder %v2416_v13, 1 }
 0x74a   :  { %2901 = vmatprep.subr.mxu0 %v3120_v8 }
 0x74b   :  { %2902 = vmatpush3.msra.mxu0 %v3003_v35 }
 0x74c   :  { %2903 = vmatprep.subr.mxu0 %v3120_v8 }
 0x74d   :  { %2904 = vmatpush3.msra.mxu0 %v3004_v37 }
 0x74e   :  { %2905 = vmatprep.subr.mxu0 %v3120_v8 }
 0x74f   :  { %2906 = vmatpush3.msra.mxu0 %v3005_v38 }
 0x750   :  { %2908 = vmatmul.mubr.msk.f32.vlgmr.msra.gmra.mxu0 %vm397_vm7, %v2166_v33 }
 0x808   :  { %v2236_v40 = vpop.f32.mrf.mxu0  ;;  %v2306_v41 = vpop.f32.mrf.mxu1 }
 0x809   :  { %v2237_v14 = vadd.f32 %v3367_v36, %v2236_v40  ;;  %v2307_v44 = vadd.f32 %v3375_v42, %v2306_v41 }
 0x80a   :  { %v2887_v43 = vpop.f32.mrf.mxu0  ;;  %v2898_v60 = vpop.f32.mrf.mxu1 }
 0x80b   :  { %v2381_v1 = vrot.slane %v2237_v14, 2  ;;  %v2391_v47 = vrot.slane %v2307_v44, 2 }
 0x80d   :  { %v2383_v45 = vadd.f32 %v2381_v1, %v3357_v30  ;;  %v2393_v50 = vadd.f32 %v2391_v47, %v3355_v29 }
 0x80f   :  { %v2498_v46 = vmul.f32 -1.442695, %v2383_v45  ;;  %v2499_v51 = vmul.f32 -1.442695, %v2393_v50 }
 0x810   :  { %v2376_v49 = vpop.f32.mrf.mxu0 }
 0x811   :  { %2992 = vpow2.f32 %v2498_v46  ;;  %v2377_v54 = vadd.f32 %v3385_v56, %v2376_v49  ;;  %v2500_v56 = vld [vmem:[%s3708_s14] ss:$0 sm:$0xff] }
 0x812   :  { %v2909_v8 = vpop.f32.mrf.mxu0  ;;  %2994 = vpow2.f32 %v2499_v51 }
 0x813   :  { %v2401_v57 = vrot.slane %v2377_v54, 2 }
 0x81e   :  { %v2993_v52 = vpop.eup %2992 }
 0x81f   :  { %v2387_v53 = vadd.f32 1.0, %v2993_v52  ;;  %v2995_v36 = vpop.eup %2994 }
 0x820   :  { %v2397_v55 = vadd.f32 1.0, %v2995_v36 }
 0x821   :  { %2996 = vrcp.f32 %v2387_v53 }
 0x822   :  { %2998 = vrcp.f32 %v2397_v55 }
 0x82e   :  { %v2997_v42 = vpop.eup %2996 }
 0x82f   :  { %v2403_v30 = vmul.f32 %v2997_v42, %v2401_v57  ;;  %v2999_v59 = vpop.eup %2998 }
 0x830   :  { %v2406_v9 = vsub.f32 1.0, %v2999_v59  ;;  %v2410_v11 = vmul.f32 %v2999_v59, %v2408_v7 }
 0x831   :  { %v2404_v58 = vadd.f32 %v2403_v30, %v3362_v34  ;;  %v2501_v34 = vld [vmem:[#allocation2] ss:$0 sm:$0xff] }
 0x833   :  { %3000 = vtanh.f32 %v2404_v58 }
 0x840   :  { %v3001_v29 = vpop.eup %3000 }
 0x841   :  { %v2407_v10 = vmul.f32 %v3001_v29, %v2406_v9 }
 0x843   :  { %v2411_v12 = vadd.f32 %v2410_v11, %v2407_v10 }
 0x845   :  { %v2419_v17 = vrot.slane %v2411_v12, 6 }
 0x847   :  { %v2421_v18 = vsel %vm2417_vm1, %v2419_v17, %v2166_v33 }
 0x848   :  { %v2429_v20 = vmul.f32 %v2500_v56, %v2421_v18 }
 0x84a   :  { %v2431_v21 = vsel %vm2430_vm3, %v2429_v20, 0.0 }
 0x84b   :  { %2432 = vadd.xlane.f32.xlu0 %v2431_v21 }
 0x8d4   :  { %v2433_v61 = vpop.xlane.xlu0 %2432 }
 0x8d5   :  { %v2441_v15 = vadd.f32 %v2501_v34, %v2433_v61 }
 0x8d7   :  { %2443 = vst.msk [vmem:[%s3710_s16] sm:$0x3] %vm2442_vm4, %v2441_v15 }
 0x8d8   :  { %2448 = vsyncpa [#allocation4], 1 }
 0x8d9   :  { %2449 = vsyncpa [#allocation6], 1 }
 0x8da   :  { %2450 = vsyncpa [#allocation9], 1 }

</bundles_post_ra>
